<compile_context>
chip_gen: v7x
topology: tpu7x:2x2x1
jax: 0.10.0
libtpu: 0.0.40
codegen_flags: <defaults>
</compile_context>

<pallas_src>
import functools
import math

import numpy as np
import jax
import jax.numpy as jnp
from jax.experimental import pallas as pl
from jax.experimental.pallas import tpu as pltpu


def positional_encoding(seq_len, d_model):
    position = np.arange(seq_len, dtype=np.float32)[:, None]
    div_term = np.exp(np.arange(0, d_model, 2, dtype=np.float32)
                      * (-np.log(10000.0) / d_model))
    pe = np.zeros((seq_len, d_model), dtype=np.float32)
    pe[:, 0::2] = np.sin(position * div_term)
    pe[:, 1::2] = np.cos(position * div_term)
    return jnp.asarray(pe)


def _mha_kernel(q_ref, k_ref, v_ref, peq_ref, pe_ref,
                wq_ref, bq_ref, wk_ref, bk_ref, wv_ref, bv_ref, wo_ref, bo_ref,
                out_ref, attn_ref,
                k_scr, v_scr,
                *, num_heads, d_k, d_model, tq):
    qt = pl.program_id(1)          # query-tile index
    h = pl.program_id(2)           # head index (innermost, sequential)
    scale = 1.0 / math.sqrt(d_k)

    # ---- K/V projection for this head: computed once per batch element
    #      (first query tile), cached in bf16 VMEM scratch for all later tiles.
    @pl.when(qt == 0)
    def _():
        k_in = (k_ref[0] + pe_ref[...]).astype(jnp.bfloat16)            # (S, D)
        v_in = (v_ref[0] + pe_ref[...]).astype(jnp.bfloat16)
        kp = jnp.dot(k_in, wk_ref[0],
                     preferred_element_type=jnp.float32) + bk_ref[0]    # (S, d_k)
        vp = jnp.dot(v_in, wv_ref[0],
                     preferred_element_type=jnp.float32) + bv_ref[0]
        k_scr[h] = kp.astype(jnp.bfloat16)
        v_scr[h] = vp.astype(jnp.bfloat16)

    # ---- Q projection for this (query tile, head); fold 1/sqrt(d_k) into q. --
    q_in = (q_ref[0] + peq_ref[...]).astype(jnp.bfloat16)               # (TQ, D)
    qp = jnp.dot(q_in, wq_ref[0],
                 preferred_element_type=jnp.float32) + bq_ref[0]        # (TQ, d_k)
    qh = (qp * scale).astype(jnp.bfloat16)

    # ---- scores = q @ k^T without an explicit transpose (contract d_k). ------
    scores = jax.lax.dot_general(
        qh, k_scr[h],
        dimension_numbers=(((1,), (1,)), ((), ())),
        preferred_element_type=jnp.float32)                             # (TQ, S)

    # ---- numerically-stable softmax in f32; divide via EUP reciprocal. -------
    m = jnp.max(scores, axis=-1, keepdims=True)
    e = jnp.exp(scores - m)
    denom = jnp.sum(e, axis=-1, keepdims=True)
    attn = e * pl.reciprocal(denom, approx=True)                        # (TQ, S)
    attn_ref[0, 0] = attn

    # ---- context and output projection, accumulated over heads in out_ref. ---
    ctx = jnp.dot(attn.astype(jnp.bfloat16), v_scr[h],
                  preferred_element_type=jnp.float32)                   # (TQ, d_k)

    @pl.when(h == 0)
    def _():
        out_ref[0] = jnp.zeros((tq, d_model), dtype=out_ref.dtype)

    out_ref[0] += jnp.dot(ctx.astype(jnp.bfloat16), wo_ref[0],
                          preferred_element_type=jnp.float32)           # (TQ, D)

    @pl.when(h == num_heads - 1)
    def _():
        out_ref[0] = out_ref[0] + bo_ref[...]


def _choose_q_tile(seq_len):
    for t in (512, 256, 128):
        if seq_len % t == 0:
            return t
    return seq_len


def multi_head_attention(Q, K, V, params, *, num_heads):
    B, S, D = Q.shape
    assert D % num_heads == 0
    d_k = D // num_heads
    wq, bq, wk, bk, wv, bv, wo, bo = params

    # Host-side layout prep (cheap, outside the kernel): per-head weight slices,
    # pre-cast to bf16 for the MXU.
    def w_in(w):   # (D, D) -> (H, D, d_k): column slice per head
        return jnp.transpose(w.reshape(D, num_heads, d_k), (1, 0, 2)).astype(jnp.bfloat16)

    def b_in(b):   # (1, D) -> (H, 1, d_k)
        return jnp.transpose(b.reshape(1, num_heads, d_k), (1, 0, 2))

    wq_h, wk_h, wv_h = w_in(wq), w_in(wk), w_in(wv)
    bq_h, bk_h, bv_h = b_in(bq), b_in(bk), b_in(bv)
    wo_h = wo.reshape(num_heads, d_k, D).astype(jnp.bfloat16)   # row slice per head
    pe = positional_encoding(S, D)

    tq = _choose_q_tile(S)
    n_qt = S // tq

    kernel = functools.partial(_mha_kernel, num_heads=num_heads, d_k=d_k,
                               d_model=D, tq=tq)

    head_w = pl.BlockSpec((1, D, d_k), lambda b, qt, h: (h, 0, 0))
    head_b = pl.BlockSpec((1, 1, d_k), lambda b, qt, h: (h, 0, 0))

    grid_spec = pltpu.PrefetchScalarGridSpec(
        num_scalar_prefetch=0,
        grid=(B, n_qt, num_heads),
        in_specs=[
            pl.BlockSpec((1, tq, D), lambda b, qt, h: (b, qt, 0)),   # Q tile
            pl.BlockSpec((1, S, D), lambda b, qt, h: (b, 0, 0)),     # K (full seq)
            pl.BlockSpec((1, S, D), lambda b, qt, h: (b, 0, 0)),     # V (full seq)
            pl.BlockSpec((tq, D), lambda b, qt, h: (qt, 0)),         # PE rows of Q tile
            pl.BlockSpec((S, D), lambda b, qt, h: (0, 0)),           # PE (full, invariant)
            head_w,                                                  # Wq head slice
            head_b,                                                  # bq head slice
            head_w,                                                  # Wk head slice
            head_b,                                                  # bk head slice
            head_w,                                                  # Wv head slice
            head_b,                                                  # bv head slice
            pl.BlockSpec((1, d_k, D), lambda b, qt, h: (h, 0, 0)),   # Wo rows for head
            pl.BlockSpec((1, D), lambda b, qt, h: (0, 0)),           # bo (invariant)
        ],
        out_specs=[
            pl.BlockSpec((1, tq, D), lambda b, qt, h: (b, qt, 0)),         # output
            pl.BlockSpec((1, 1, tq, S), lambda b, qt, h: (b, h, qt, 0)),   # attn weights
        ],
        scratch_shapes=[
            pltpu.VMEM((num_heads, S, d_k), jnp.bfloat16),   # cached K projections
            pltpu.VMEM((num_heads, S, d_k), jnp.bfloat16),   # cached V projections
        ],
    )

    out_shape = (
        jax.ShapeDtypeStruct((B, S, D), jnp.float32),
        jax.ShapeDtypeStruct((B, num_heads, S, S), jnp.float32),
    )

    return pl.pallas_call(
        kernel,
        out_shape=out_shape,
        grid_spec=grid_spec,
        compiler_params=pltpu.CompilerParams(
            # Batch axis is megacore-parallel.  The q-tile axis stays "arbitrary"
            # because the per-batch K/V scratch is filled at qt == 0 and reused
            # by later tiles; heads are the sequential output-reduction axis.
            dimension_semantics=("parallel", "arbitrary", "arbitrary"),
            # Fits v7x's 64 MiB VMEM; can be raised toward ~100 MiB on v5e/v6e.
            vmem_limit_bytes=64 * 1024 * 1024,
        ),
    )(Q, K, V, pe, pe, wq_h, bq_h, wk_h, bk_h, wv_h, bv_h, wo_h, bo)


def init_params(key, d_model):
    # torch.nn.Linear default init: U(-1/sqrt(in_features), 1/sqrt(in_features))
    bound = 1.0 / np.sqrt(d_model)
    keys = jax.random.split(key, 8)

    def lin(kw, kb):
        w = jax.random.uniform(kw, (d_model, d_model), jnp.float32, -bound, bound)
        b = jax.random.uniform(kb, (1, d_model), jnp.float32, -bound, bound)
        return w, b

    wq, bq = lin(keys[0], keys[1])
    wk, bk = lin(keys[2], keys[3])
    wv, bv = lin(keys[4], keys[5])
    wo, bo = lin(keys[6], keys[7])
    return (wq, bq, wk, bk, wv, bv, wo, bo)


def reference(Q, K, V, params, *, num_heads):
    wq, bq, wk, bk, wv, bv, wo, bo = params
    B, S, D = Q.shape
    d_k = D // num_heads
    pe = positional_encoding(S, D)
    Q = Q + pe[None]
    K = K + pe[None]
    V = V + pe[None]

    def proj(x, w, b):
        y = x @ w + b
        return y.reshape(B, S, num_heads, d_k).transpose(0, 2, 1, 3)

    q = proj(Q, wq, bq)
    k = proj(K, wk, bk)
    v = proj(V, wv, bv)
    scores = jnp.einsum("bhqd,bhkd->bhqk", q, k) / jnp.sqrt(jnp.float32(d_k))
    attn = jax.nn.softmax(scores, axis=-1)
    out = jnp.einsum("bhqk,bhkd->bhqd", attn, v)
    out = out.transpose(0, 2, 1, 3).reshape(B, S, D)
    out = out @ wo + bo
    return out, attn


if __name__ == "__main__":
    # TODO(synk): optional attention mask (mask=None path of the torch forward) not implemented.
    B, S, D, H = 2, 8, 32, 4   # small shapes; d_model=32 divisible by num_heads=4
    key = jax.random.PRNGKey(0)
    kq, kk, kv, kp = jax.random.split(key, 4)
    Q = jax.random.normal(kq, (B, S, D), jnp.float32)
    K = jax.random.normal(kk, (B, S, D), jnp.float32)
    V = jax.random.normal(kv, (B, S, D), jnp.float32)
    params = init_params(kp, D)

    out, attn = multi_head_attention(Q, K, V, params, num_heads=H)
    jax.block_until_ready((out, attn))

    out_expected, attn_expected = reference(Q, K, V, params, num_heads=H)
    # bf16 matmuls + approximate reciprocal => compare against the f32 reference
    # with a correspondingly looser tolerance.
    np.testing.assert_allclose(np.asarray(out), np.asarray(out_expected),
                               rtol=3e-2, atol=3e-2)
    np.testing.assert_allclose(np.asarray(attn), np.asarray(attn_expected),
                               rtol=3e-2, atol=3e-2)

    print("KERNEL_OK")
</pallas_src>

<mosaic_0001>
module attributes {stable_mosaic.version = 11 : i64} {
  func.func @_mha_kernel(%arg0: i32, %arg1: i32, %arg2: i32, %arg3: memref<1x8x32xf32, #tpu.memory_space<vmem>>, %arg4: memref<1x8x32xf32, #tpu.memory_space<vmem>>, %arg5: memref<1x8x32xf32, #tpu.memory_space<vmem>>, %arg6: memref<8x32xf32, #tpu.memory_space<vmem>>, %arg7: memref<8x32xf32, #tpu.memory_space<vmem>>, %arg8: memref<1x32x8xbf16, #tpu.memory_space<vmem>>, %arg9: memref<1x1x8xf32, #tpu.memory_space<vmem>>, %arg10: memref<1x32x8xbf16, #tpu.memory_space<vmem>>, %arg11: memref<1x1x8xf32, #tpu.memory_space<vmem>>, %arg12: memref<1x32x8xbf16, #tpu.memory_space<vmem>>, %arg13: memref<1x1x8xf32, #tpu.memory_space<vmem>>, %arg14: memref<1x8x32xbf16, #tpu.memory_space<vmem>>, %arg15: memref<1x32xf32, #tpu.memory_space<vmem>>, %arg16: memref<1x8x32xf32, #tpu.memory_space<vmem>>, %arg17: memref<1x1x8x8xf32, #tpu.memory_space<vmem>>, %arg18: memref<4x8x8xbf16, #tpu.memory_space<vmem>>, %arg19: memref<4x8x8xbf16, #tpu.memory_space<vmem>>) attributes {dimension_semantics = [#tpu.dimension_semantics<parallel>, #tpu.dimension_semantics<arbitrary>, #tpu.dimension_semantics<arbitrary>], iteration_bounds = array<i64: 2, 1, 4>, scalar_prefetch = 0 : i64, scratch_operands = 2 : i64, tpu.core_type = #tpu.core_type<tc>, window_params = [{transform_indices = @transform_0, window_bounds = array<i64: 1, 8, 32>}, {transform_indices = @transform_1, window_bounds = array<i64: 1, 8, 32>}, {transform_indices = @transform_2, window_bounds = array<i64: 1, 8, 32>}, {transform_indices = @transform_3, window_bounds = array<i64: 8, 32>}, {pipeline_mode = #tpu.pipeline_mode<synchronous>, transform_indices = @transform_4, window_bounds = array<i64: 8, 32>}, {transform_indices = @transform_5, window_bounds = array<i64: 1, 32, 8>}, {transform_indices = @transform_6, window_bounds = array<i64: 1, 1, 8>}, {transform_indices = @transform_7, window_bounds = array<i64: 1, 32, 8>}, {transform_indices = @transform_8, window_bounds = array<i64: 1, 1, 8>}, {transform_indices = @transform_9, window_bounds = array<i64: 1, 32, 8>}, {transform_indices = @transform_10, window_bounds = array<i64: 1, 1, 8>}, {transform_indices = @transform_11, window_bounds = array<i64: 1, 8, 32>}, {pipeline_mode = #tpu.pipeline_mode<synchronous>, transform_indices = @transform_12, window_bounds = array<i64: 1, 32>}, {transform_indices = @transform_13, window_bounds = array<i64: 1, 8, 32>}, {transform_indices = @transform_14, window_bounds = array<i64: 1, 1, 8, 8>}]} {
    %c0_i32 = arith.constant 0 : i32
    %0 = arith.cmpi eq, %arg1, %c0_i32 : i32
    %1 = arith.extui %0 : i1 to i32
    %c0_i32_0 = arith.constant 0 : i32
    %2 = arith.cmpi ne, %1, %c0_i32_0 : i32
    scf.if %2 {
      %c0_37 = arith.constant 0 : index
      %c0_38 = arith.constant 0 : index
      %c0_39 = arith.constant 0 : index
      %56 = vector.load %arg4[%c0_37, %c0_38, %c0_39] : memref<1x8x32xf32, #tpu.memory_space<vmem>>, vector<1x8x32xf32>
      %57 = vector.shape_cast %56 : vector<1x8x32xf32> to vector<8x32xf32>
      %c0_40 = arith.constant 0 : index
      %c0_41 = arith.constant 0 : index
      %58 = vector.load %arg7[%c0_40, %c0_41] : memref<8x32xf32, #tpu.memory_space<vmem>>, vector<8x32xf32>
      %59 = arith.addf %57, %58 : vector<8x32xf32>
      %60 = arith.truncf %59 : vector<8x32xf32> to vector<8x32xbf16>
      %c0_42 = arith.constant 0 : index
      %c0_43 = arith.constant 0 : index
      %c0_44 = arith.constant 0 : index
      %61 = vector.load %arg5[%c0_42, %c0_43, %c0_44] : memref<1x8x32xf32, #tpu.memory_space<vmem>>, vector<1x8x32xf32>
      %62 = vector.shape_cast %61 : vector<1x8x32xf32> to vector<8x32xf32>
      %c0_45 = arith.constant 0 : index
      %c0_46 = arith.constant 0 : index
      %63 = vector.load %arg7[%c0_45, %c0_46] : memref<8x32xf32, #tpu.memory_space<vmem>>, vector<8x32xf32>
      %64 = arith.addf %62, %63 : vector<8x32xf32>
      %65 = arith.truncf %64 : vector<8x32xf32> to vector<8x32xbf16>
      %c0_47 = arith.constant 0 : index
      %c0_48 = arith.constant 0 : index
      %c0_49 = arith.constant 0 : index
      %66 = vector.load %arg10[%c0_47, %c0_48, %c0_49] : memref<1x32x8xbf16, #tpu.memory_space<vmem>>, vector<1x32x8xbf16>
      %67 = vector.shape_cast %66 : vector<1x32x8xbf16> to vector<32x8xbf16>
      %cst_50 = arith.constant dense<0.000000e+00> : vector<8x8xf32>
      %68 = tpu.matmul %60, %67, %cst_50 {dimension_numbers = #tpu.dot_dimension_numbers<[1], [0], [0], [1], [0, 0, 1, 1], [], []>} : vector<8x32xbf16>, vector<32x8xbf16>, vector<8x8xf32> -> vector<8x8xf32>
      %c0_51 = arith.constant 0 : index
      %c0_52 = arith.constant 0 : index
      %c0_53 = arith.constant 0 : index
      %69 = vector.load %arg11[%c0_51, %c0_52, %c0_53] : memref<1x1x8xf32, #tpu.memory_space<vmem>>, vector<1x1x8xf32>
      %70 = vector.shape_cast %69 : vector<1x1x8xf32> to vector<1x8xf32>
      %71 = vector.broadcast %70 : vector<1x8xf32> to vector<8x8xf32>
      %72 = arith.addf %68, %71 : vector<8x8xf32>
      %c0_54 = arith.constant 0 : index
      %c0_55 = arith.constant 0 : index
      %c0_56 = arith.constant 0 : index
      %73 = vector.load %arg12[%c0_54, %c0_55, %c0_56] : memref<1x32x8xbf16, #tpu.memory_space<vmem>>, vector<1x32x8xbf16>
      %74 = vector.shape_cast %73 : vector<1x32x8xbf16> to vector<32x8xbf16>
      %cst_57 = arith.constant dense<0.000000e+00> : vector<8x8xf32>
      %75 = tpu.matmul %65, %74, %cst_57 {dimension_numbers = #tpu.dot_dimension_numbers<[1], [0], [0], [1], [0, 0, 1, 1], [], []>} : vector<8x32xbf16>, vector<32x8xbf16>, vector<8x8xf32> -> vector<8x8xf32>
      %c0_58 = arith.constant 0 : index
      %c0_59 = arith.constant 0 : index
      %c0_60 = arith.constant 0 : index
      %76 = vector.load %arg13[%c0_58, %c0_59, %c0_60] : memref<1x1x8xf32, #tpu.memory_space<vmem>>, vector<1x1x8xf32>
      %77 = vector.shape_cast %76 : vector<1x1x8xf32> to vector<1x8xf32>
      %78 = vector.broadcast %77 : vector<1x8xf32> to vector<8x8xf32>
      %79 = arith.addf %75, %78 : vector<8x8xf32>
      %80 = arith.truncf %72 : vector<8x8xf32> to vector<8x8xbf16>
      %81 = arith.index_cast %arg2 : i32 to index
      %c0_61 = arith.constant 0 : index
      %c0_62 = arith.constant 0 : index
      %82 = vector.load %arg18[%81, %c0_61, %c0_62] : memref<4x8x8xbf16, #tpu.memory_space<vmem>>, vector<1x8x8xbf16>
      %83 = vector.shape_cast %82 : vector<1x8x8xbf16> to vector<8x8xbf16>
      %84 = vector.shape_cast %80 : vector<8x8xbf16> to vector<1x8x8xbf16>
      tpu.vector_store %arg18[%81, %c0_61, %c0_62], %84 {strides = array<i32>} : memref<4x8x8xbf16, #tpu.memory_space<vmem>>, vector<1x8x8xbf16>,
      %85 = arith.truncf %79 : vector<8x8xf32> to vector<8x8xbf16>
      %86 = arith.index_cast %arg2 : i32 to index
      %c0_63 = arith.constant 0 : index
      %c0_64 = arith.constant 0 : index
      %87 = vector.load %arg19[%86, %c0_63, %c0_64] : memref<4x8x8xbf16, #tpu.memory_space<vmem>>, vector<1x8x8xbf16>
      %88 = vector.shape_cast %87 : vector<1x8x8xbf16> to vector<8x8xbf16>
      %89 = vector.shape_cast %85 : vector<8x8xbf16> to vector<1x8x8xbf16>
      tpu.vector_store %arg19[%86, %c0_63, %c0_64], %89 {strides = array<i32>} : memref<4x8x8xbf16, #tpu.memory_space<vmem>>, vector<1x8x8xbf16>,
    } else {
    }
    %c0 = arith.constant 0 : index
    %c0_1 = arith.constant 0 : index
    %c0_2 = arith.constant 0 : index
    %3 = vector.load %arg3[%c0, %c0_1, %c0_2] : memref<1x8x32xf32, #tpu.memory_space<vmem>>, vector<1x8x32xf32>
    %4 = vector.shape_cast %3 : vector<1x8x32xf32> to vector<8x32xf32>
    %c0_3 = arith.constant 0 : index
    %c0_4 = arith.constant 0 : index
    %5 = vector.load %arg6[%c0_3, %c0_4] : memref<8x32xf32, #tpu.memory_space<vmem>>, vector<8x32xf32>
    %6 = arith.addf %4, %5 : vector<8x32xf32>
    %7 = arith.truncf %6 : vector<8x32xf32> to vector<8x32xbf16>
    %c0_5 = arith.constant 0 : index
    %c0_6 = arith.constant 0 : index
    %c0_7 = arith.constant 0 : index
    %8 = vector.load %arg8[%c0_5, %c0_6, %c0_7] : memref<1x32x8xbf16, #tpu.memory_space<vmem>>, vector<1x32x8xbf16>
    %9 = vector.shape_cast %8 : vector<1x32x8xbf16> to vector<32x8xbf16>
    %cst = arith.constant dense<0.000000e+00> : vector<8x8xf32>
    %10 = tpu.matmul %7, %9, %cst {dimension_numbers = #tpu.dot_dimension_numbers<[1], [0], [0], [1], [0, 0, 1, 1], [], []>} : vector<8x32xbf16>, vector<32x8xbf16>, vector<8x8xf32> -> vector<8x8xf32>
    %c0_8 = arith.constant 0 : index
    %c0_9 = arith.constant 0 : index
    %c0_10 = arith.constant 0 : index
    %11 = vector.load %arg9[%c0_8, %c0_9, %c0_10] : memref<1x1x8xf32, #tpu.memory_space<vmem>>, vector<1x1x8xf32>
    %12 = vector.shape_cast %11 : vector<1x1x8xf32> to vector<1x8xf32>
    %13 = vector.broadcast %12 : vector<1x8xf32> to vector<8x8xf32>
    %14 = arith.addf %10, %13 : vector<8x8xf32>
    %cst_11 = arith.constant 0.353553385 : f32
    %15 = vector.broadcast %cst_11 : f32 to vector<8x8xf32>
    %16 = arith.mulf %14, %15 : vector<8x8xf32>
    %17 = arith.truncf %16 : vector<8x8xf32> to vector<8x8xbf16>
    %18 = arith.index_cast %arg2 : i32 to index
    %c0_12 = arith.constant 0 : index
    %c0_13 = arith.constant 0 : index
    %19 = vector.load %arg18[%18, %c0_12, %c0_13] : memref<4x8x8xbf16, #tpu.memory_space<vmem>>, vector<1x8x8xbf16>
    %20 = vector.shape_cast %19 : vector<1x8x8xbf16> to vector<8x8xbf16>
    %cst_14 = arith.constant dense<0.000000e+00> : vector<8x8xf32>
    %21 = tpu.matmul %17, %20, %cst_14 {dimension_numbers = #tpu.dot_dimension_numbers<[1], [1], [0], [0], [0, 0, 1, 0], [], []>} : vector<8x8xbf16>, vector<8x8xbf16>, vector<8x8xf32> -> vector<8x8xf32>
    %cst_15 = arith.constant dense<0xFF800000> : vector<8xf32>
    %22 = vector.multi_reduction <maximumf>, %21, %cst_15 [1] : vector<8x8xf32> to vector<8xf32>
    %23 = vector.shape_cast %22 : vector<8xf32> to vector<8x1xf32>
    %24 = vector.broadcast %23 : vector<8x1xf32> to vector<8x8xf32>
    %25 = arith.subf %21, %24 : vector<8x8xf32>
    %26 = math.exp %25 : vector<8x8xf32>
    %cst_16 = arith.constant dense<0.000000e+00> : vector<8xf32>
    %27 = vector.multi_reduction <add>, %26, %cst_16 [1] : vector<8x8xf32> to vector<8xf32>
    %28 = vector.shape_cast %27 : vector<8xf32> to vector<8x1xf32>
    %29 = tpu.reciprocal %28 {approx = true} : vector<8x1xf32> -> vector<8x1xf32>
    %30 = vector.broadcast %29 : vector<8x1xf32> to vector<8x8xf32>
    %31 = arith.mulf %26, %30 : vector<8x8xf32>
    %c0_17 = arith.constant 0 : index
    %c0_18 = arith.constant 0 : index
    %c0_19 = arith.constant 0 : index
    %c0_20 = arith.constant 0 : index
    %32 = vector.load %arg17[%c0_17, %c0_18, %c0_19, %c0_20] : memref<1x1x8x8xf32, #tpu.memory_space<vmem>>, vector<1x1x8x8xf32>
    %33 = vector.shape_cast %32 : vector<1x1x8x8xf32> to vector<8x8xf32>
    %34 = vector.shape_cast %31 : vector<8x8xf32> to vector<1x1x8x8xf32>
    tpu.vector_store %arg17[%c0_17, %c0_18, %c0_19, %c0_20], %34 {strides = array<i32>} : memref<1x1x8x8xf32, #tpu.memory_space<vmem>>, vector<1x1x8x8xf32>,
    %35 = arith.truncf %31 : vector<8x8xf32> to vector<8x8xbf16>
    %36 = arith.index_cast %arg2 : i32 to index
    %c0_21 = arith.constant 0 : index
    %c0_22 = arith.constant 0 : index
    %37 = vector.load %arg19[%36, %c0_21, %c0_22] : memref<4x8x8xbf16, #tpu.memory_space<vmem>>, vector<1x8x8xbf16>
    %38 = vector.shape_cast %37 : vector<1x8x8xbf16> to vector<8x8xbf16>
    %cst_23 = arith.constant dense<0.000000e+00> : vector<8x8xf32>
    %39 = tpu.matmul %35, %38, %cst_23 {dimension_numbers = #tpu.dot_dimension_numbers<[1], [0], [0], [1], [0, 0, 1, 1], [], []>} : vector<8x8xbf16>, vector<8x8xbf16>, vector<8x8xf32> -> vector<8x8xf32>
    %c0_i32_24 = arith.constant 0 : i32
    %40 = arith.cmpi eq, %arg2, %c0_i32_24 : i32
    %41 = arith.extui %40 : i1 to i32
    %c0_i32_25 = arith.constant 0 : i32
    %42 = arith.cmpi ne, %41, %c0_i32_25 : i32
    scf.if %42 {
      %cst_37 = arith.constant 0.000000e+00 : f32
      %56 = vector.broadcast %cst_37 : f32 to vector<8x32xf32>
      %c0_38 = arith.constant 0 : index
      %c0_39 = arith.constant 0 : index
      %c0_40 = arith.constant 0 : index
      %57 = vector.load %arg16[%c0_38, %c0_39, %c0_40] : memref<1x8x32xf32, #tpu.memory_space<vmem>>, vector<1x8x32xf32>
      %58 = vector.shape_cast %57 : vector<1x8x32xf32> to vector<8x32xf32>
      %59 = vector.shape_cast %56 : vector<8x32xf32> to vector<1x8x32xf32>
      tpu.vector_store %arg16[%c0_38, %c0_39, %c0_40], %59 {strides = array<i32>} : memref<1x8x32xf32, #tpu.memory_space<vmem>>, vector<1x8x32xf32>,
    } else {
    }
    %c0_26 = arith.constant 0 : index
    %c0_27 = arith.constant 0 : index
    %c0_28 = arith.constant 0 : index
    %43 = vector.load %arg16[%c0_26, %c0_27, %c0_28] : memref<1x8x32xf32, #tpu.memory_space<vmem>>, vector<1x8x32xf32>
    %44 = vector.shape_cast %43 : vector<1x8x32xf32> to vector<8x32xf32>
    %45 = arith.truncf %39 : vector<8x8xf32> to vector<8x8xbf16>
    %c0_29 = arith.constant 0 : index
    %c0_30 = arith.constant 0 : index
    %c0_31 = arith.constant 0 : index
    %46 = vector.load %arg14[%c0_29, %c0_30, %c0_31] : memref<1x8x32xbf16, #tpu.memory_space<vmem>>, vector<1x8x32xbf16>
    %47 = vector.shape_cast %46 : vector<1x8x32xbf16> to vector<8x32xbf16>
    %cst_32 = arith.constant dense<0.000000e+00> : vector<8x32xf32>
    %48 = tpu.matmul %45, %47, %cst_32 {dimension_numbers = #tpu.dot_dimension_numbers<[1], [0], [0], [1], [0, 0, 1, 1], [], []>} : vector<8x8xbf16>, vector<8x32xbf16>, vector<8x32xf32> -> vector<8x32xf32>
    %49 = arith.addf %44, %48 : vector<8x32xf32>
    %c0_33 = arith.constant 0 : index
    %c0_34 = arith.constant 0 : index
    %c0_35 = arith.constant 0 : index
    %50 = vector.load %arg16[%c0_33, %c0_34, %c0_35] : memref<1x8x32xf32, #tpu.memory_space<vmem>>, vector<1x8x32xf32>
    %51 = vector.shape_cast %50 : vector<1x8x32xf32> to vector<8x32xf32>
    %52 = vector.shape_cast %49 : vector<8x32xf32> to vector<1x8x32xf32>
    tpu.vector_store %arg16[%c0_33, %c0_34, %c0_35], %52 {strides = array<i32>} : memref<1x8x32xf32, #tpu.memory_space<vmem>>, vector<1x8x32xf32>,
    %c3_i32 = arith.constant 3 : i32
    %53 = arith.cmpi eq, %arg2, %c3_i32 : i32
    %54 = arith.extui %53 : i1 to i32
    %c0_i32_36 = arith.constant 0 : i32
    %55 = arith.cmpi ne, %54, %c0_i32_36 : i32
    scf.if %55 {
      %c0_37 = arith.constant 0 : index
      %c0_38 = arith.constant 0 : index
      %c0_39 = arith.constant 0 : index
      %56 = vector.load %arg16[%c0_37, %c0_38, %c0_39] : memref<1x8x32xf32, #tpu.memory_space<vmem>>, vector<1x8x32xf32>
      %57 = vector.shape_cast %56 : vector<1x8x32xf32> to vector<8x32xf32>
      %c0_40 = arith.constant 0 : index
      %c0_41 = arith.constant 0 : index
      %58 = vector.load %arg15[%c0_40, %c0_41] : memref<1x32xf32, #tpu.memory_space<vmem>>, vector<1x32xf32>
      %59 = vector.broadcast %58 : vector<1x32xf32> to vector<8x32xf32>
      %60 = arith.addf %57, %59 : vector<8x32xf32>
      %c0_42 = arith.constant 0 : index
      %c0_43 = arith.constant 0 : index
      %c0_44 = arith.constant 0 : index
      %61 = vector.load %arg16[%c0_42, %c0_43, %c0_44] : memref<1x8x32xf32, #tpu.memory_space<vmem>>, vector<1x8x32xf32>
      %62 = vector.shape_cast %61 : vector<1x8x32xf32> to vector<8x32xf32>
      %63 = vector.shape_cast %60 : vector<8x32xf32> to vector<1x8x32xf32>
      tpu.vector_store %arg16[%c0_42, %c0_43, %c0_44], %63 {strides = array<i32>} : memref<1x8x32xf32, #tpu.memory_space<vmem>>, vector<1x8x32xf32>,
    } else {
    }
    return
  }
  func.func @transform_0(%arg0: i32, %arg1: i32, %arg2: i32) -> (i32, i32, i32) {
    %c0_i32 = arith.constant 0 : i32
    %c0_i32_0 = arith.constant 0 : i32
    return %arg0, %arg1, %c0_i32 : i32, i32, i32
  }
  func.func @transform_1(%arg0: i32, %arg1: i32, %arg2: i32) -> (i32, i32, i32) {
    %c0_i32 = arith.constant 0 : i32
    %c0_i32_0 = arith.constant 0 : i32
    %c0_i32_1 = arith.constant 0 : i32
    return %arg0, %c0_i32, %c0_i32_0 : i32, i32, i32
  }
  func.func @transform_2(%arg0: i32, %arg1: i32, %arg2: i32) -> (i32, i32, i32) {
    %c0_i32 = arith.constant 0 : i32
    %c0_i32_0 = arith.constant 0 : i32
    %c0_i32_1 = arith.constant 0 : i32
    return %arg0, %c0_i32, %c0_i32_0 : i32, i32, i32
  }
  func.func @transform_3(%arg0: i32, %arg1: i32, %arg2: i32) -> (i32, i32) {
    %c0_i32 = arith.constant 0 : i32
    %c0_i32_0 = arith.constant 0 : i32
    return %arg1, %c0_i32 : i32, i32
  }
  func.func @transform_4(%arg0: i32, %arg1: i32, %arg2: i32) -> (i32, i32) {
    %c0_i32 = arith.constant 0 : i32
    %c0_i32_0 = arith.constant 0 : i32
    %c0_i32_1 = arith.constant 0 : i32
    return %c0_i32, %c0_i32_0 : i32, i32
  }
  func.func @transform_5(%arg0: i32, %arg1: i32, %arg2: i32) -> (i32, i32, i32) {
    %c0_i32 = arith.constant 0 : i32
    %c0_i32_0 = arith.constant 0 : i32
    %c0_i32_1 = arith.constant 0 : i32
    return %arg2, %c0_i32, %c0_i32_0 : i32, i32, i32
  }
  func.func @transform_6(%arg0: i32, %arg1: i32, %arg2: i32) -> (i32, i32, i32) {
    %c0_i32 = arith.constant 0 : i32
    %c0_i32_0 = arith.constant 0 : i32
    %c0_i32_1 = arith.constant 0 : i32
    return %arg2, %c0_i32, %c0_i32_0 : i32, i32, i32
  }
  func.func @transform_7(%arg0: i32, %arg1: i32, %arg2: i32) -> (i32, i32, i32) {
    %c0_i32 = arith.constant 0 : i32
    %c0_i32_0 = arith.constant 0 : i32
    %c0_i32_1 = arith.constant 0 : i32
    return %arg2, %c0_i32, %c0_i32_0 : i32, i32, i32
  }
  func.func @transform_8(%arg0: i32, %arg1: i32, %arg2: i32) -> (i32, i32, i32) {
    %c0_i32 = arith.constant 0 : i32
    %c0_i32_0 = arith.constant 0 : i32
    %c0_i32_1 = arith.constant 0 : i32
    return %arg2, %c0_i32, %c0_i32_0 : i32, i32, i32
  }
  func.func @transform_9(%arg0: i32, %arg1: i32, %arg2: i32) -> (i32, i32, i32) {
    %c0_i32 = arith.constant 0 : i32
    %c0_i32_0 = arith.constant 0 : i32
    %c0_i32_1 = arith.constant 0 : i32
    return %arg2, %c0_i32, %c0_i32_0 : i32, i32, i32
  }
  func.func @transform_10(%arg0: i32, %arg1: i32, %arg2: i32) -> (i32, i32, i32) {
    %c0_i32 = arith.constant 0 : i32
    %c0_i32_0 = arith.constant 0 : i32
    %c0_i32_1 = arith.constant 0 : i32
    return %arg2, %c0_i32, %c0_i32_0 : i32, i32, i32
  }
  func.func @transform_11(%arg0: i32, %arg1: i32, %arg2: i32) -> (i32, i32, i32) {
    %c0_i32 = arith.constant 0 : i32
    %c0_i32_0 = arith.constant 0 : i32
    %c0_i32_1 = arith.constant 0 : i32
    return %arg2, %c0_i32, %c0_i32_0 : i32, i32, i32
  }
  func.func @transform_12(%arg0: i32, %arg1: i32, %arg2: i32) -> (i32, i32) {
    %c0_i32 = arith.constant 0 : i32
    %c0_i32_0 = arith.constant 0 : i32
    %c0_i32_1 = arith.constant 0 : i32
    return %c0_i32, %c0_i32_0 : i32, i32
  }
  func.func @transform_13(%arg0: i32, %arg1: i32, %arg2: i32) -> (i32, i32, i32) {
    %c0_i32 = arith.constant 0 : i32
    %c0_i32_0 = arith.constant 0 : i32
    return %arg0, %arg1, %c0_i32 : i32, i32, i32
  }
  func.func @transform_14(%arg0: i32, %arg1: i32, %arg2: i32) -> (i32, i32, i32, i32) {
    %c0_i32 = arith.constant 0 : i32
    %c0_i32_0 = arith.constant 0 : i32
    return %arg0, %arg2, %arg1, %c0_i32 : i32, i32, i32, i32
  }
}

</mosaic_0001>

<bundles_post_ra>
// kernel: tpu_custom_call.1
= control target key start
LH: loop header
LB: loop body
LE: loop exit
PB: predicated region body
PF: predicated region fallthrough
CT: control target
= control target key end

     0   :  { %s3550_s0 = inlined_call_operand.hbm [shape: f32[2,8,32], index: 0, kind: input, shape index: {}]   ;;  %s3551_s1 = inlined_call_operand.hbm [shape: f32[2,8,32], index: 1, kind: input, shape index: {}]   ;;  %s3552_s2 = inlined_call_operand.hbm [shape: f32[2,8,32], index: 2, kind: input, shape index: {}]   ;;  %s3553_s3 = inlined_call_operand.hbm [shape: f32[8,32], index: 3, kind: input, shape index: {}]   ;;  %s3554_s4 = inlined_call_operand.hbm [shape: f32[8,32], index: 4, kind: input, shape index: {}]   ;;  %s3555_s5 = inlined_call_operand.hbm [shape: bf16[4,32,8], index: 5, kind: input, shape index: {}]   ;;  %s3556_s6 = inlined_call_operand.hbm [shape: f32[4,1,8], index: 6, kind: input, shape index: {}]   ;;  %s3557_s7 = inlined_call_operand.hbm [shape: bf16[4,32,8], index: 7, kind: input, shape index: {}]   ;;  %s3558_s8 = inlined_call_operand.hbm [shape: f32[4,1,8], index: 8, kind: input, shape index: {}]   ;;  %s3559_s9 = inlined_call_operand.hbm [shape: bf16[4,32,8], index: 9, kind: input, shape index: {}]   ;;  %s3560_s10 = inlined_call_operand.hbm [shape: f32[4,1,8], index: 10, kind: input, shape index: {}]   ;;  %s3561_s11 = inlined_call_operand.hbm [shape: bf16[4,8,32], index: 11, kind: input, shape index: {}]   ;;  %s3562_s12 = inlined_call_operand.hbm [shape: f32[1,32], index: 12, kind: input, shape index: {}]   ;;  %s3563_s13 = inlined_call_operand.hbm [shape: f32[2,8,32], index: 13, kind: output, shape index: {0}]   ;;  %s3564_s14 = inlined_call_operand.hbm [shape: f32[2,4,8,8], index: 14, kind: output, shape index: {1}]  }
   0x1   :  { %3617 = sst [smem:[#allocation59_spill]] %s3550_s0 }
   0x2   :  { %3618 = sst [smem:[#allocation60_spill]] %s3551_s1 }
   0x3   :  { %3619 = sst [smem:[#allocation61_spill]] %s3552_s2 }
   0x4   :  { %3620 = sst [smem:[#allocation62_spill]] %s3553_s3 }
   0x5   :  { %3621 = sst [smem:[#allocation63_spill]] %s3554_s4 }
   0x6   :  { %3622 = sst [smem:[#allocation64_spill]] %s3555_s5 }
   0x7   :  { %3623 = sst [smem:[#allocation65_spill]] %s3556_s6 }
   0x8   :  { %3624 = sst [smem:[#allocation66_spill]] %s3557_s7 }
   0x9   :  { %3625 = sst [smem:[#allocation67_spill]] %s3558_s8 }
   0xa   :  { %3626 = sst [smem:[#allocation68_spill]] %s3559_s9 }
   0xb   :  { %3627 = sst [smem:[#allocation69_spill]] %s3560_s10 }
   0xc   :  { %3628 = sst [smem:[#allocation70_spill]] %s3561_s11 }
   0xd   :  { %3629 = sst [smem:[#allocation71_spill]] %s3562_s12 }
   0xe   :  { %3630 = sst [smem:[#allocation72_spill]] %s3563_s13 }
   0xf   :  { %3631 = sst [smem:[#allocation73_spill]] %s3564_s14 }
  0x10   :  { %20 = vsyncpa [#allocation5], 0 }
  0x11   :  { %22 = vsyncpa [#allocation5 + $0x1], 0 }
  0x12   :  { %23 = vsyncpa [#allocation8], 0 }
  0x13   :  { %25 = vsyncpa [#allocation8 + $0x1], 0 }
  0x14   :  { %26 = vsyncpa [#allocation11], 0 }
  0x15   :  { %27 = vsyncpa [#allocation14], 0 }
  0x16   :  { %29 = vsyncpa [#allocation14 + $0x1], 0 }
  0x17   :  { %30 = vsyncpa [#allocation17], 0 }
  0x18   :  { %32 = vsyncpa [#allocation17 + $0x1], 0 }
  0x19   :  { %33 = vsyncpa [#allocation20], 0 }
  0x1a   :  { %35 = vsyncpa [#allocation20 + $0x1], 0 }
  0x1b   :  { %36 = vsyncpa [#allocation23], 0 }
  0x1c   :  { %38 = vsyncpa [#allocation23 + $0x1], 0 }
  0x1d   :  { %39 = vsyncpa [#allocation6], 0 }
  0x1e   :  { %41 = vsyncpa [#allocation6 + $0x1], 0 }
  0x1f   :  { %42 = vsyncpa [#allocation27], 0 }
  0x20   :  { %44 = vsyncpa [#allocation27 + $0x1], 0  ;;  %s2716_s29 = smov 0   ;;  %s2718_s30 = smov 0  }
  0x21   :  { %s2720_s15 = smov 0   ;;  %s2722_s16 = smov 0  }
  0x22   :  { %s2724_s17 = smov 0   ;;  %s2726_s18 = smov 0  }
  0x23   :  { %s2728_s19 = smov 0   ;;  %s2730_s20 = smov 0  }
  0x24   :  { %s2732_s21 = smov 0   ;;  %s2734_s22 = smov 0  }
  0x25   :  { %s2736_s23 = smov 0   ;;  %s2738_s24 = smov 0  }
  0x26   :  { %s2740_s25 = smov 0   ;;  %s2742_s26 = smov 0  }
  0x27 LB: > { %3632 = sst [smem:[#allocation38_spill]] %s2567_s29  ;;  %s2785_s27 = sadd.s32 4294967295, %s2619_s26   ;;  %s2619_s26 = sphi %s2742_s26, %s50_s26   ;;  %s2615_s25 = sphi %s2740_s25, %s3748_s25   ;;  %s2611_s24 = sphi %s2738_s24, %s3747_s24   ;;  %s2607_s23 = sphi %s2736_s23, %s3740_s23   ;;  %s2603_s22 = sphi %s2734_s22, %s3746_s22   ;;  %s2599_s21 = sphi %s2732_s21, %s3745_s21   ;;  %s2595_s20 = sphi %s2730_s20, %s3744_s20   ;;  %s2591_s19 = sphi %s2728_s19, %s3743_s19   ;;  %s2587_s18 = sphi %s2726_s18, %s3738_s18   ;;  %s2583_s17 = sphi %s2724_s17, %s3737_s17   ;;  %s2579_s16 = sphi %s2722_s16, %s3736_s16   ;;  %s2575_s15 = sphi %s2720_s15, %s3735_s15   ;;  %s2571_s30 = sphi %s2718_s30, %s3734_s30   ;;  %s2567_s29 = sphi %s2716_s29, %s3733_s29  }
  0x28   : > { %3633 = sst [smem:[#allocation39_spill]] %s2571_s30  ;;  %p216_p0 = scmp.ne.s32.totalorder %s2583_s17, %s2579_s16 }
  0x29   : > { %3634 = sst [smem:[#allocation40_spill]] %s2575_s15  ;;  %p3577_p1 = scmp.eq.s32.totalorder %s2785_s27, 0 }
  0x2a   : > { %3635 = sst [smem:[#allocation41_spill]] %s2583_s17  ;;  %p1680_p2 = scmp.ge.s32.totalorder %s2619_s26, 1 }
  0x2b   : > { %3636 = sst [smem:[#allocation42_spill]] %s2587_s18  ;;  %p462_p3 = scmp.lt.s32.totalorder %s2619_s26, 9 }
  0x2c   : > { %3637 = sst [smem:[#allocation43_spill]] %s2591_s19  ;;  %p2793_p4 = por %p216_p0, %p3577_p1 }
  0x2d   : > { %3638 = sst [smem:[#allocation44_spill]] %s2603_s22  ;;  %p2797_p5 = pnand %p1680_p2, %p462_p3 }
  0x2e   : > { %3639 = sst [smem:[#allocation45_spill]] %s2607_s23  ;;  %s2621_s13 = smov [#allocation10]  }
  0x2f   : > { %3640 = sst [smem:[#allocation46_spill]] %s2615_s25  ;;  %s477_s23 = sshll.u32 %s2621_s13, 4  ;;  %s478_s23 = int_to_ptr.vmem [resolvable:$true] %s477_s23 }
  0x30   : > { %3641 = sst [smem:[#allocation47_spill]] %s2619_s26  ;;  %p1843_p6 = pneg %p2797_p5 }
  0x31   : > { %s3642_s28 = scalar_select %p2793_p4, 1, 0 }
  0x32   : > { %s3644_s14 = scalar_select %p2797_p5, 1, 0 }
  0x33   : > { %3643 = sst [smem:[#allocation48_spill]] %s3642_s28  ;;  %s2622_s22 = smov [#allocation24]  }
  0x34   : > { %3645 = sst [smem:[#allocation49_spill]] %s3644_s14  ;;  %s499_s16 = sshll.u32 %s2622_s22, 4  ;;  %s2809_s16 = int_to_ptr.vmem [resolvable:$true] %s499_s16 }
  0x35   : > { %p2805_p7 = pnand %p1843_p6, %p3577_p1  ;;  %s3647_s3 = sld [smem:[#allocation62_spill]] }
  0x37   : > { %s3646_s11 = scalar_select %p2805_p7, 1, 0 }
  0x38   : > { %p2819_p9 = pneg %p2805_p7 }
  0x3a   : > { %s3648_s13 = scalar_select %p2819_p9, 1, 0 }
  0x3b   : > { %s2029_s8 = scalar_lea.hbm %s3647_s3, 128 }
  0x3c   : > { %p2030_p8 = scmp.ne.s32.totalorder %s3647_s3, %s2029_s8  ;;  %p2036_p12 = scmp.lt.u32.totalorder %s2029_s8, %s3647_s3 }
  0x3e   : > { %p2032_p10 = pnand %p2819_p9, %p2030_p8 }
  0x40   : > { %p2033_p11 = pneg %p2032_p10 }
  0x42   : > { %p2038_p13 = pnand %p2036_p12, %p2033_p11 }
  0x44   : > { %2041 = shalt.err (!%p2038_p13)
}
  0x45   : > { %s2042_s10 = scalar_lea.vmem %s478_s23, 128  ;;  %p2050_p6 = scmp.lt.s32.totalorder %s478_s23, %s478_s23 }
  0x46   : > { %p2043_p0 = scmp.ne.s32.totalorder %s478_s23, %s2042_s10  ;;  %p2051_p1 = scmp.lt.s32.totalorder %s2042_s10, %s2042_s10 }
  0x48   : > { %p2045_p2 = pnand %p2043_p0, %p2819_p9  ;;  %p2052_p4 = por %p2051_p1, %p2050_p6 }
  0x4a   : > { %p2046_p3 = pneg %p2045_p2 }
  0x4c   : > { %p2053_p5 = pnand %p2052_p4, %p2046_p3 }
  0x4e   : > { %2056 = shalt.err (!%p2053_p5)
}
  0x4f   : > { %1846 = dma.hbm_to_vmem [thread:$0]  (!%p2805_p7), %s3647_s3, 128, %s478_s23, [#allocation11]  }
  0x50   : > { %s3649_s12 = sld [smem:[#allocation71_spill]] }
  0x56   : > { %s2057_s28 = scalar_lea.hbm %s3649_s12, 16 }
  0x57   : > { %p2058_p8 = scmp.ne.s32.totalorder %s3649_s12, %s2057_s28  ;;  %p2064_p4 = scmp.lt.u32.totalorder %s2057_s28, %s3649_s12 }
  0x59   : > { %p2060_p10 = pnand %p2058_p8, %p2819_p9 }
  0x5b   : > { %p2061_p1 = pneg %p2060_p10 }
  0x5d   : > { %p2066_p5 = pnand %p2064_p4, %p2061_p1 }
  0x5f   : > { %2069 = shalt.err (!%p2066_p5)
}
  0x60   : > { %s2070_s23 = scalar_lea.vmem %s2809_s16, 16  ;;  %s2077_s0 = scalar_lea.vmem %s2809_s16, 32 }
  0x61   : > { %p2071_p11 = scmp.ne.s32.totalorder %s2809_s16, %s2070_s23  ;;  %p2078_p0 = scmp.lt.s32.totalorder %s2809_s16, %s2809_s16 }
  0x62   : > { %p2079_p2 = scmp.lt.s32.totalorder %s2077_s0, %s2070_s23 }
  0x63   : > { %p2073_p12 = pnand %p2071_p11, %p2819_p9 }
  0x64   : > { %p2080_p3 = por %p2079_p2, %p2078_p0 }
  0x65   : > { %p2074_p13 = pneg %p2073_p12 }
  0x67   : > { %p2081_p6 = pnand %p2080_p3, %p2074_p13 }
  0x69   : > { %2084 = shalt.err (!%p2081_p6)
}
  0x6a   : > { %1852 = dma.hbm_to_vmem [thread:$0]  (!%p2805_p7), %s3649_s12, 16, %s2809_s16, [#allocation23]  }
  0x6b   : > { %s1679_s6 = sadd.s32 4294967294, %s2619_s26   ;;  %s62_s8 = sadd.s32 1, %s2611_s24 }
  0x6c   : > { %p63_p8 = scmp.ge.s32.totalorder %s62_s8, 4  ;;  %s69_s14 = sadd.s32 1, %s2615_s25 }
  0x6d   : > { %s78_s28 = sadd.s32 1, %s2599_s21  ;;  %p85_p10 = scmp.ne.s32.totalorder %s2599_s21, %s2595_s20 }
  0x6e   : > { %s3750_s8 = smov (%p63_p8, %s62_s8), 0  ;;  %s3752_s14 = smov (!%p63_p8, %s69_s14), %s2615_s25 }
  0x6f   : > { %3650 = sst [smem:[#allocation50_spill]] %s3750_s8  ;;  %p86_p1 = scmp.eq.s32.totalorder %s2619_s26, 0 }
  0x70   : > { %p91_p4 = scmp.ne.s32.totalorder %s2595_s20, %s2591_s19  ;;  %p71_p5 = scmp.ge.s32.totalorder %s3752_s14, 2 }
  0x71   : > { %s200_s16 = ssub.s32 %s2611_s24, %s3750_s8  ;;  %p2878_p11 = por %p86_p1, %p85_p10 }
  0x72   : > { %p3652_p12 = scmp.eq.s32.totalorder %s2785_s27, 0  ;;  %s3754_s14 = smov (%p71_p5, %s3752_s14), 0 }
  0x73   : > { %3654 = sst [smem:[#allocation51_spill]] %s3754_s14  ;;  %p201_p0 = scmp.eq.s32.totalorder %s200_s16, 0 }
  0x74   : > { %p2887_p13 = por %p3652_p12, %p91_p4  ;;  %s203_s23 = sadd.s32 1, %s2587_s18 }
  0x75   : > { %s73_s0 = ssub.s32 %s2615_s25, %s3754_s14  ;;  %p210_p2 = scmp.ne.s32.totalorder %s2587_s18, %s2583_s17 }
  0x76   : > { %s3653_s10 = scalar_select %p2887_p13, 1, 0 }
  0x77   : > { %p76_p3 = scmp.eq.s32.totalorder %s73_s0, 0  ;;  %p419_p6 = scmp.eq.s32.totalorder %s2785_s27, 7 }
  0x78   : > { %s2900_s4 = scalar_select %p201_p0, %s2587_s18, %s203_s23  }
  0x79   : > { %s2903_s2 = scalar_select %p76_p3, %s2599_s21, %s78_s28  }
  0x7a   : > { %3655 = sst [smem:[#allocation52_spill]] %s2900_s4  ;;  %p2907_p8 = por %p210_p2, %p86_p1 }
  0x7b   : > { %3656 = sst [smem:[#allocation53_spill]] %s2903_s2  ;;  %p2914_p5 = por %p419_p6, %p85_p10 }
  0x7c   : > { %p425_p12 = scmp.eq.s32.totalorder %s1679_s6, 7  ;;  %s433_s14 = sor.u32 %s200_s16, %s73_s0 }
  0x7d   : > { %s3658_s12 = scalar_select %p2914_p5, 1, 0 }
  0x7e   : > { %p436_p0 = scmp.eq.s32.totalorder %s433_s14, 0  ;;  %s438_s23 = sadd.s32 1, %s2575_s15 }
  0x7f   : > { %3659 = sst [smem:[#allocation54_spill]] %s3658_s12  ;;  %p2922_p3 = por %p425_p12, %p91_p4 }
  0x80   : > { %p448_p1 = scmp.ne.s32.totalorder %s2575_s15, %s2571_s30  ;;  %p454_p10 = scmp.ne.s32.totalorder %s2571_s30, %s2567_s29 }
  0x81   : > { %s3660_s28 = scalar_select %p2922_p3, 1, 0 }
  0x82   : > { %s2929_s8 = scalar_select %p436_p0, %s2575_s15, %s438_s23  }
  0x83   : > { %3661 = sst [smem:[#allocation55_spill]] %s3660_s28  ;;  %p2931_p2 = por %p448_p1, %p419_p6 }
  0x84   : > { %3662 = sst [smem:[#allocation56_spill]] %s2929_s8  ;;  %p1894_p5 = scmp.lt.s32.totalorder %s2619_s26, 8 }
  0x85   : > { %s3663_s2 = scalar_select %p2931_p2, 1, 0 }
  0x86   : > { %s3588_s4 = sand.u32 1, %s2599_s21   ;;  %p2939_p13 = por %p454_p10, %p425_p12 }
  0x87   : > { %3664 = sst [smem:[#allocation57_spill]] %s3663_s2  ;;  %s2945_s14 = sshll.u32 %s3588_s4, 3 }
  0x88   : > { %s3665_s6 = scalar_select %p2939_p13, 1, 0 }
  0x89   : > { %s2948_s16 = sshll.u32 %s2615_s25, 7  ;;  %p2952_p4 = pnand %p1894_p5, %p2878_p11 }
  0x8a   : > { %3666 = sst [smem:[#allocation58_spill]] %s3665_s6  ;;  %s2957_s23 = sand.u32 1, %s2619_s26  }
  0x8b   : > { %s3667_s0 = scalar_select %p2952_p4, 1, 0 }
  0x8c   : > { %s3668_s1 = sld [smem:[#allocation60_spill]]  ;;  %s533_s4 = scalar_lea.vmem [#allocation7], %s2945_s14 }
  0x8d   : > { %s540_s22 = sshll.u32 %s533_s4, 4  ;;  %p2970_p11 = pnand %p1894_p5, %p2907_p8  ;;  %s2966_s22 = int_to_ptr.vmem [resolvable:$true] %s540_s22 }
  0x8e   : > { %p2979_p12 = pneg %p2952_p4 }
  0x8f   : > { %s3669_s25 = scalar_select %p2970_p11, 1, 0 }
  0x90   : > { %s3670_s15 = scalar_select %p2979_p12, 1, 0 }
  0x92   : > { %s2963_s6 = scalar_lea.hbm %s3668_s1, %s2948_s16  ;;  %s2090_s3 = scalar_lea.hbm %s3668_s1, 256 }
  0x93   : > { %s2085_s28 = scalar_lea.hbm %s2963_s6, 128  ;;  %p2091_p8 = scmp.lt.u32.totalorder %s2963_s6, %s3668_s1 }
  0x94   : > { %p2086_p6 = scmp.ne.s32.totalorder %s2963_s6, %s2085_s28  ;;  %p2092_p5 = scmp.lt.u32.totalorder %s2090_s3, %s2085_s28 }
  0x95   : > { %p2094_p13 = scmp.lt.u32.totalorder %s2085_s28, %s2963_s6 }
  0x96   : > { %p2088_p0 = pnand %p2979_p12, %p2086_p6  ;;  %p2093_p10 = por %p2092_p5, %p2091_p8 }
  0x98   : > { %p2089_p1 = pneg %p2088_p0  ;;  %p2095_p3 = por %p2094_p13, %p2093_p10 }
  0x9a   : > { %p2096_p2 = pnand %p2095_p3, %p2089_p1 }
  0x9c   : > { %2099 = shalt.err (!%p2096_p2)
}
  0x9d   : > { %s2100_s29 = scalar_lea.vmem %s2966_s22, 128  ;;  %s2623_s8 = smov [#allocation7]  }
  0x9e   : > { %p2101_p6 = scmp.ne.s32.totalorder %s2966_s22, %s2100_s29  ;;  %s2105_s4 = sshll.u32 %s2623_s8, 4  ;;  %s2106_s4 = int_to_ptr.vmem [resolvable:$false] %s2105_s4 }
  0x9f   : > { %s2107_s19 = scalar_lea.vmem %s2106_s4, 256  ;;  %p2108_p9 = scmp.lt.s32.totalorder %s2966_s22, %s2106_s4 }
  0xa0   : > { %p2103_p0 = pnand %p2101_p6, %p2979_p12  ;;  %p2109_p11 = scmp.lt.s32.totalorder %s2107_s19, %s2100_s29 }
  0xa2   : > { %p2104_p7 = pneg %p2103_p0  ;;  %p2110_p8 = por %p2109_p11, %p2108_p9 }
  0xa4   : > { %p2111_p5 = pnand %p2110_p8, %p2104_p7 }
  0xa6   : > { %2114 = shalt.err (!%p2111_p5)
}
  0xa7   : > { %s3671_s26 = scalar_lea.sflag [#allocation8], %s2957_s23  ;;  %s3005_s28 = sand.u32 1, %s2587_s18  }
  0xa8   : > { %1859 = dma.hbm_to_vmem [thread:$0]  (!%p2952_p4), %s2963_s6, 128, %s2966_s22, %s3671_s26  }
  0xa9   : > { %s3008_s3 = sshll.u32 %s2611_s24, 8  ;;  %s3011_s29 = sshll.u32 %s3005_s28, 4 }
  0xaa   : > { %s3672_s5 = sld [smem:[#allocation64_spill]]  ;;  %s569_s1 = scalar_lea.vmem [#allocation13], %s3011_s29 }
  0xab   : > { %s576_s6 = sshll.u32 %s569_s1, 4  ;;  %p3673_p9 = scmp.ne.s32.totalorder %s3669_s25, 0  ;;  %s3020_s6 = int_to_ptr.vmem [resolvable:$true] %s576_s6 }
  0xad   : > { %p3027_p13 = pneg %p3673_p9 }
  0xaf   : > { %s3674_s18 = scalar_select %p3027_p13, 1, 0 }
  0xb0   : > { %s3017_s19 = scalar_lea.hbm %s3672_s5, %s3008_s3  ;;  %s2120_s2 = scalar_lea.hbm %s3672_s5, 1024 }
  0xb1   : > { %s2115_s26 = scalar_lea.hbm %s3017_s19, 256  ;;  %p2121_p11 = scmp.lt.u32.totalorder %s3017_s19, %s3672_s5 }
  0xb2   : > { %p2116_p7 = scmp.ne.s32.totalorder %s3017_s19, %s2115_s26  ;;  %p2122_p1 = scmp.lt.u32.totalorder %s2120_s2, %s2115_s26 }
  0xb3   : > { %p2124_p6 = scmp.lt.u32.totalorder %s2115_s26, %s3017_s19 }
  0xb4   : > { %p2118_p3 = pnand %p3027_p13, %p2116_p7  ;;  %p2123_p10 = por %p2122_p1, %p2121_p11 }
  0xb6   : > { %p2119_p2 = pneg %p2118_p3  ;;  %p2125_p0 = por %p2124_p6, %p2123_p10 }
  0xb8   : > { %p2126_p8 = pnand %p2125_p0, %p2119_p2 }
  0xba   : > { %2129 = shalt.err (!%p2126_p8)
}
  0xbb   : > { %s2130_s22 = scalar_lea.vmem %s3020_s6, 256  ;;  %s2624_s8 = smov [#allocation13]  }
  0xbc   : > { %p2131_p5 = scmp.ne.s32.totalorder %s3020_s6, %s2130_s22  ;;  %s2135_s4 = sshll.u32 %s2624_s8, 4  ;;  %s2136_s4 = int_to_ptr.vmem [resolvable:$false] %s2135_s4 }
  0xbd   : > { %s2137_s12 = scalar_lea.vmem %s2136_s4, 512  ;;  %p2138_p4 = scmp.lt.s32.totalorder %s3020_s6, %s2136_s4 }
  0xbe   : > { %p2133_p7 = pnand %p2131_p5, %p3027_p13  ;;  %p2139_p12 = scmp.lt.s32.totalorder %s2137_s12, %s2130_s22 }
  0xc0   : > { %p2134_p3 = pneg %p2133_p7  ;;  %p2140_p11 = por %p2139_p12, %p2138_p4 }
  0xc2   : > { %p2141_p1 = pnand %p2140_p11, %p2134_p3 }
  0xc4   : > { %2144 = shalt.err (!%p2141_p1)
}
  0xc5   : > { %s2625_s2 = smov 64   ;;  %s2626_s26 = smov 4  }
  0xc6   : > { %s3675_s1 = scalar_lea.sflag [#allocation14], %s2957_s23  ;;  %s3676_s7 = sld [smem:[#allocation66_spill]] }
  0xc7   : > { %1865 = dma.hbm_to_vmem [thread:$0]  (!%p3673_p9), %s3017_s19, 256, %s3020_s6, %s3675_s1, %s2625_s2, %s2625_s2, %s2626_s26  }
  0xc8   : > { %s607_s12 = scalar_lea.vmem [#allocation16], %s3011_s29  ;;  %s3612_s30 = scalar_lea.sflag [#allocation17], %s2957_s23 }
  0xc9   : > { %s614_s5 = sshll.u32 %s607_s12, 4  ;;  %s3062_s5 = int_to_ptr.vmem [resolvable:$true] %s614_s5 }
  0xcc   : > { %s3059_s4 = scalar_lea.hbm %s3676_s7, %s3008_s3  ;;  %s2150_s1 = scalar_lea.hbm %s3676_s7, 1024 }
  0xcd   : > { %s2145_s17 = scalar_lea.hbm %s3059_s4, 256  ;;  %p2151_p10 = scmp.lt.u32.totalorder %s3059_s4, %s3676_s7 }
  0xce   : > { %p2146_p4 = scmp.ne.s32.totalorder %s3059_s4, %s2145_s17  ;;  %p2152_p6 = scmp.lt.u32.totalorder %s2150_s1, %s2145_s17 }
  0xcf   : > { %p2154_p8 = scmp.lt.u32.totalorder %s2145_s17, %s3059_s4 }
  0xd0   : > { %p2148_p12 = pnand %p2146_p4, %p3027_p13  ;;  %p2153_p0 = por %p2152_p6, %p2151_p10 }
  0xd2   : > { %p2149_p2 = pneg %p2148_p12  ;;  %p2155_p5 = por %p2154_p8, %p2153_p0 }
  0xd4   : > { %p2156_p7 = pnand %p2155_p5, %p2149_p2 }
  0xd6   : > { %2159 = shalt.err (!%p2156_p7)
}
  0xd7   : > { %s2160_s12 = scalar_lea.vmem %s3062_s5, 256  ;;  %s2627_s19 = smov [#allocation16]  }
  0xd8   : > { %p2161_p3 = scmp.ne.s32.totalorder %s3062_s5, %s2160_s12  ;;  %s2165_s6 = sshll.u32 %s2627_s19, 4  ;;  %s2166_s6 = int_to_ptr.vmem [resolvable:$false] %s2165_s6 }
  0xd9   : > { %s2167_s22 = scalar_lea.vmem %s2166_s6, 512  ;;  %p2168_p4 = scmp.lt.s32.totalorder %s3062_s5, %s2166_s6 }
  0xda   : > { %p2163_p11 = pnand %p2161_p3, %p3027_p13  ;;  %p2169_p12 = scmp.lt.s32.totalorder %s2167_s22, %s2160_s12 }
  0xdc   : > { %p2164_p1 = pneg %p2163_p11  ;;  %p2170_p10 = por %p2169_p12, %p2168_p4 }
  0xde   : > { %p2171_p6 = pnand %p2170_p10, %p2164_p1 }
  0xe0   : > { %2174 = shalt.err (!%p2171_p6)
}
  0xe1   : > { %1871 = dma.hbm_to_vmem [thread:$0]  (!%p3673_p9), %s3059_s4, 256, %s3062_s5, %s3612_s30, %s2625_s2, %s2625_s2, %s2626_s26  }
  0xe2   : > { %s3677_s9 = sld [smem:[#allocation68_spill]]  ;;  %s645_s12 = scalar_lea.vmem [#allocation19], %s3011_s29 }
  0xe3   : > { %s652_s19 = sshll.u32 %s645_s12, 4  ;;  %s642_s6 = scalar_lea.sflag [#allocation20], %s2957_s23  ;;  %s3098_s19 = int_to_ptr.vmem [resolvable:$true] %s652_s19 }
  0xe8   : > { %s3095_s8 = scalar_lea.hbm %s3677_s9, %s3008_s3  ;;  %s2180_s17 = scalar_lea.hbm %s3677_s9, 1024 }
  0xe9   : > { %s2175_s22 = scalar_lea.hbm %s3095_s8, 256  ;;  %p2181_p5 = scmp.lt.u32.totalorder %s3095_s8, %s3677_s9 }
  0xea   : > { %p2176_p2 = scmp.ne.s32.totalorder %s3095_s8, %s2175_s22  ;;  %p2182_p7 = scmp.lt.u32.totalorder %s2180_s17, %s2175_s22 }
  0xeb   : > { %p2184_p11 = scmp.lt.u32.totalorder %s2175_s22, %s3095_s8 }
  0xec   : > { %p2178_p0 = pnand %p2176_p2, %p3027_p13  ;;  %p2183_p3 = por %p2182_p7, %p2181_p5 }
  0xee   : > { %p2179_p8 = pneg %p2178_p0  ;;  %p2185_p1 = por %p2184_p11, %p2183_p3 }
  0xf0   : > { %p2186_p4 = pnand %p2185_p1, %p2179_p8 }
  0xf2   : > { %2189 = shalt.err (!%p2186_p4)
}
  0xf3   : > { %s2190_s29 = scalar_lea.vmem %s3098_s19, 256  ;;  %s2628_s12 = smov [#allocation19]  }
  0xf4   : > { %p2191_p12 = scmp.ne.s32.totalorder %s3098_s19, %s2190_s29  ;;  %s2195_s5 = sshll.u32 %s2628_s12, 4  ;;  %s2196_s5 = int_to_ptr.vmem [resolvable:$false] %s2195_s5 }
  0xf5   : > { %s2197_s4 = scalar_lea.vmem %s2196_s5, 512  ;;  %p2198_p2 = scmp.lt.s32.totalorder %s3098_s19, %s2196_s5 }
  0xf6   : > { %p2193_p10 = pnand %p2191_p12, %p3027_p13  ;;  %p2199_p0 = scmp.lt.s32.totalorder %s2197_s4, %s2190_s29 }
  0xf8   : > { %p2194_p6 = pneg %p2193_p10  ;;  %p2200_p5 = por %p2199_p0, %p2198_p2 }
  0xfa   : > { %p2201_p7 = pnand %p2200_p5, %p2194_p6 }
  0xfc   : > { %2204 = shalt.err (!%p2201_p7)
}
  0xfd   : > { %1877 = dma.hbm_to_vmem [thread:$0]  (!%p3673_p9), %s3095_s8, 256, %s3098_s19, %s642_s6, %s2625_s2, %s2625_s2, %s2626_s26  }
  0xfe   : > { %s2629_s22 = smov [#allocation12]   ;;  %s3678_s29 = sld [smem:[#allocation63_spill]] }
  0xff   : > { %s488_s17 = sshll.u32 %s2629_s22, 4  ;;  %p3680_p3 = scmp.ne.s32.totalorder %s3648_s13, 0  ;;  %s489_s17 = int_to_ptr.vmem [resolvable:$true] %s488_s17 }
 0x104   : > { %s3679_s12 = smov %s3678_s29  ;;  %s2205_s5 = scalar_lea.hbm %s3678_s29, 128 }
 0x105   : > { %p2206_p8 = scmp.ne.s32.totalorder %s3679_s12, %s2205_s5  ;;  %p2212_p4 = scmp.lt.u32.totalorder %s2205_s5, %s3679_s12 }
 0x107   : > { %p2208_p11 = pnand %p2206_p8, %p3680_p3 }
 0x109   : > { %p2209_p1 = pneg %p2208_p11 }
 0x10b   : > { %p2214_p12 = pnand %p2212_p4, %p2209_p1 }
 0x10d   : > { %2217 = shalt.err (!%p2214_p12)
}
 0x10e   : > { %s2218_s2 = scalar_lea.vmem %s489_s17, 128  ;;  %p2226_p0 = scmp.lt.s32.totalorder %s489_s17, %s489_s17 }
 0x10f   : > { %p2219_p10 = scmp.ne.s32.totalorder %s489_s17, %s2218_s2  ;;  %p2227_p5 = scmp.lt.s32.totalorder %s2218_s2, %s2218_s2 }
 0x111   : > { %p2221_p6 = pnand %p2219_p10, %p3680_p3  ;;  %p2228_p7 = por %p2227_p5, %p2226_p0 }
 0x113   : > { %p2222_p2 = pneg %p2221_p6 }
 0x115   : > { %p2229_p9 = pnand %p2228_p7, %p2222_p2 }
 0x117   : > { %2232 = shalt.err (!%p2229_p9)
}
 0x118   : > { %p3681_p8 = scmp.ne.s32.totalorder %s3646_s11, 0  ;;  %s3682_s13 = sld [smem:[#allocation59_spill]] }
 0x119   : > { %s514_s19 = scalar_lea.vmem [#allocation4], %s2945_s14  ;;  %s3683_s11 = sand.u32 1, %s2599_s21  }
 0x11a   : > { %1849 = dma.hbm_to_vmem [thread:$0]  (!%p3681_p8), %s3679_s12, 128, %s489_s17, [#allocation11]  }
 0x11b   : > { %s522_s22 = sshll.u32 %s514_s19, 4  ;;  %s511_s3 = scalar_lea.sflag [#allocation5], %s3683_s11  ;;  %s523_s22 = int_to_ptr.vmem [resolvable:$true] %s522_s22 }
 0x11c   : > { %p3684_p3 = scmp.ne.s32.totalorder %s3670_s15, 0 }
 0x11e   : > { %s3149_s8 = scalar_lea.hbm %s3682_s13, %s2948_s16  ;;  %s2238_s5 = scalar_lea.hbm %s3682_s13, 256 }
 0x11f   : > { %s2233_s1 = scalar_lea.hbm %s3149_s8, 128  ;;  %p2239_p4 = scmp.lt.u32.totalorder %s3149_s8, %s3682_s13 }
 0x120   : > { %p2234_p9 = scmp.ne.s32.totalorder %s3149_s8, %s2233_s1  ;;  %p2240_p12 = scmp.lt.u32.totalorder %s2238_s5, %s2233_s1 }
 0x121   : > { %p2242_p6 = scmp.lt.u32.totalorder %s2233_s1, %s3149_s8 }
 0x122   : > { %p2236_p11 = pnand %p2234_p9, %p3684_p3  ;;  %p2241_p10 = por %p2240_p12, %p2239_p4 }
 0x124   : > { %p2237_p1 = pneg %p2236_p11  ;;  %p2243_p2 = por %p2242_p6, %p2241_p10 }
 0x126   : > { %p2244_p0 = pnand %p2243_p2, %p2237_p1 }
 0x128   : > { %2247 = shalt.err (!%p2244_p0)
}
 0x129   : > { %s2248_s30 = scalar_lea.vmem %s523_s22, 128  ;;  %s2630_s26 = smov [#allocation4]  }
 0x12a   : > { %p2249_p5 = scmp.ne.s32.totalorder %s523_s22, %s2248_s30  ;;  %s2253_s7 = sshll.u32 %s2630_s26, 4  ;;  %s2254_s7 = int_to_ptr.vmem [resolvable:$false] %s2253_s7 }
 0x12b   : > { %s2255_s9 = scalar_lea.vmem %s2254_s7, 256  ;;  %p2256_p9 = scmp.lt.s32.totalorder %s523_s22, %s2254_s7 }
 0x12c   : > { %p2251_p7 = pnand %p2249_p5, %p3684_p3  ;;  %p2257_p11 = scmp.lt.s32.totalorder %s2255_s9, %s2248_s30 }
 0x12e   : > { %p2252_p8 = pneg %p2251_p7  ;;  %p2258_p13 = por %p2257_p11, %p2256_p9 }
 0x130   : > { %p2259_p4 = pnand %p2258_p13, %p2252_p8 }
 0x132   : > { %2262 = shalt.err (!%p2259_p4)
}
 0x133   : > { %p3685_p12 = scmp.ne.s32.totalorder %s3667_s0, 0  ;;  %s3686_s1 = sld [smem:[#allocation61_spill]] }
 0x134   : > { %s551_s29 = scalar_lea.vmem [#allocation9], %s2945_s14 }
 0x135   : > { %1856 = dma.hbm_to_vmem [thread:$0]  (!%p3685_p12), %s3149_s8, 128, %s523_s22, %s511_s3  }
 0x136   : > { %s558_s5 = sshll.u32 %s551_s29, 4  ;;  %s559_s5 = int_to_ptr.vmem [resolvable:$true] %s558_s5 }
 0x139   : > { %s3175_s17 = scalar_lea.hbm %s3686_s1, %s2948_s16  ;;  %s2268_s8 = scalar_lea.hbm %s3686_s1, 256 }
 0x13a   : > { %s2263_s4 = scalar_lea.hbm %s3175_s17, 128  ;;  %p2269_p6 = scmp.lt.u32.totalorder %s3175_s17, %s3686_s1 }
 0x13b   : > { %p2264_p13 = scmp.ne.s32.totalorder %s3175_s17, %s2263_s4  ;;  %p2270_p2 = scmp.lt.u32.totalorder %s2268_s8, %s2263_s4 }
 0x13c   : > { %p2272_p5 = scmp.lt.u32.totalorder %s2263_s4, %s3175_s17 }
 0x13d   : > { %p2266_p1 = pnand %p2264_p13, %p3684_p3  ;;  %p2271_p0 = por %p2270_p2, %p2269_p6 }
 0x13f   : > { %p2267_p10 = pneg %p2266_p1  ;;  %p2273_p7 = por %p2272_p5, %p2271_p0 }
 0x141   : > { %p2274_p8 = pnand %p2273_p7, %p2267_p10 }
 0x143   : > { %2277 = shalt.err (!%p2274_p8)
}
 0x144   : > { %s2278_s14 = scalar_lea.vmem %s559_s5, 128  ;;  %s2631_s16 = smov [#allocation9]  }
 0x145   : > { %p2279_p9 = scmp.ne.s32.totalorder %s559_s5, %s2278_s14  ;;  %s2283_s26 = sshll.u32 %s2631_s16, 4  ;;  %s2284_s26 = int_to_ptr.vmem [resolvable:$false] %s2283_s26 }
 0x146   : > { %s2285_s7 = scalar_lea.vmem %s2284_s26, 256  ;;  %p2286_p13 = scmp.lt.s32.totalorder %s559_s5, %s2284_s26 }
 0x147   : > { %p2281_p11 = pnand %p2279_p9, %p3684_p3  ;;  %p2287_p1 = scmp.lt.s32.totalorder %s2285_s7, %s2278_s14 }
 0x149   : > { %p2282_p4 = pneg %p2281_p11  ;;  %p2288_p12 = por %p2287_p1, %p2286_p13 }
 0x14b   : > { %p2289_p2 = pnand %p2288_p12, %p2282_p4 }
 0x14d   : > { %2292 = shalt.err (!%p2289_p2)
}
 0x14e   : > { %p3687_p6 = scmp.ne.s32.totalorder %s3667_s0, 0  ;;  %s3688_s9 = scalar_lea.sflag [#allocation8], %s2957_s23 }
 0x14f   : > { %s3198_s15 = sshll.u32 %s2611_s24, 4  ;;  %s589_s19 = scalar_lea.vmem [#allocation15], %s3005_s28 }
 0x150   : > { %1862 = dma.hbm_to_vmem [thread:$0]  (!%p3687_p6), %s3175_s17, 128, %s559_s5, %s3688_s9  }
 0x151   : > { %s596_s11 = sshll.u32 %s589_s19, 4  ;;  %s3689_s2 = sld [smem:[#allocation65_spill]]  ;;  %s597_s11 = int_to_ptr.vmem [resolvable:$true] %s596_s11 }
 0x152   : > { %p3690_p12 = scmp.ne.s32.totalorder %s3674_s18, 0 }
 0x157   : > { %s594_s30 = scalar_lea.hbm %s3689_s2, %s3198_s15  ;;  %s2298_s3 = scalar_lea.hbm %s3689_s2, 64 }
 0x158   : > { %s2293_s8 = scalar_lea.hbm %s594_s30, 16  ;;  %p2299_p5 = scmp.lt.u32.totalorder %s594_s30, %s3689_s2 }
 0x159   : > { %p2294_p3 = scmp.ne.s32.totalorder %s594_s30, %s2293_s8  ;;  %p2300_p7 = scmp.lt.u32.totalorder %s2298_s3, %s2293_s8 }
 0x15a   : > { %p2302_p9 = scmp.lt.u32.totalorder %s2293_s8, %s594_s30 }
 0x15b   : > { %p2296_p10 = pnand %p2294_p3, %p3690_p12  ;;  %p2301_p8 = por %p2300_p7, %p2299_p5 }
 0x15d   : > { %p2297_p0 = pneg %p2296_p10  ;;  %p2303_p11 = por %p2302_p9, %p2301_p8 }
 0x15f   : > { %p2304_p4 = pnand %p2303_p11, %p2297_p0 }
 0x161   : > { %2307 = shalt.err (!%p2304_p4)
}
 0x162   : > { %s2308_s14 = scalar_lea.vmem %s597_s11, 16  ;;  %s2632_s16 = smov [#allocation15]  }
 0x163   : > { %p2309_p13 = scmp.ne.s32.totalorder %s597_s11, %s2308_s14  ;;  %s2313_s26 = sshll.u32 %s2632_s16, 4  ;;  %s2314_s26 = int_to_ptr.vmem [resolvable:$false] %s2313_s26 }
 0x164   : > { %s2315_s7 = scalar_lea.vmem %s2314_s26, 32  ;;  %p2316_p6 = scmp.lt.s32.totalorder %s597_s11, %s2314_s26 }
 0x165   : > { %p2311_p1 = pnand %p2309_p13, %p3690_p12  ;;  %p2317_p3 = scmp.lt.s32.totalorder %s2315_s7, %s2308_s14 }
 0x167   : > { %p2312_p2 = pneg %p2311_p1  ;;  %p2318_p10 = por %p2317_p3, %p2316_p6 }
 0x169   : > { %p2319_p5 = pnand %p2318_p10, %p2312_p2 }
 0x16b   : > { %2322 = shalt.err (!%p2319_p5)
}
 0x16c   : > { %p3691_p7 = scmp.ne.s32.totalorder %s3669_s25, 0  ;;  %s3692_s9 = scalar_lea.sflag [#allocation14], %s2957_s23 }
 0x16d   : > { %s3693_s4 = sld [smem:[#allocation67_spill]]  ;;  %s627_s0 = scalar_lea.vmem [#allocation18], %s3005_s28 }
 0x16e   : > { %1868 = dma.hbm_to_vmem [thread:$0]  (!%p3691_p7), %s594_s30, 16, %s597_s11, %s3692_s9  }
 0x16f   : > { %s634_s22 = sshll.u32 %s627_s0, 4  ;;  %s3694_s5 = sld [smem:[#allocation69_spill]]  ;;  %s635_s22 = int_to_ptr.vmem [resolvable:$true] %s634_s22 }
 0x173   : > { %s3223_s8 = scalar_lea.hbm %s3693_s4, %s3198_s15  ;;  %s2328_s26 = scalar_lea.hbm %s3693_s4, 64 }
 0x174   : > { %s2323_s16 = scalar_lea.hbm %s3223_s8, 16  ;;  %p2329_p11 = scmp.lt.u32.totalorder %s3223_s8, %s3693_s4 }
 0x175   : > { %s3230_s14 = scalar_lea.hbm %s3694_s5, %s3198_s15  ;;  %p2324_p0 = scmp.ne.s32.totalorder %s3223_s8, %s2323_s16 }
 0x176   : > { %p2330_p4 = scmp.lt.u32.totalorder %s2328_s26, %s2323_s16  ;;  %p2332_p1 = scmp.lt.u32.totalorder %s2323_s16, %s3223_s8 }
 0x177   : > { %p2326_p8 = pnand %p2324_p0, %p3690_p12 }
 0x178   : > { %p2331_p13 = por %p2330_p4, %p2329_p11 }
 0x179   : > { %p2327_p9 = pneg %p2326_p8 }
 0x17a   : > { %p2333_p2 = por %p2332_p1, %p2331_p13 }
 0x17c   : > { %p2334_p6 = pnand %p2333_p2, %p2327_p9 }
 0x17e   : > { %2337 = shalt.err (!%p2334_p6)
}
 0x17f   : > { %s2338_s15 = scalar_lea.vmem %s635_s22, 16  ;;  %s2633_s19 = smov [#allocation18]  }
 0x180   : > { %p2339_p3 = scmp.ne.s32.totalorder %s635_s22, %s2338_s15  ;;  %s2343_s29 = sshll.u32 %s2633_s19, 4  ;;  %s2344_s29 = int_to_ptr.vmem [resolvable:$false] %s2343_s29 }
 0x181   : > { %s2345_s0 = scalar_lea.vmem %s2344_s29, 32  ;;  %p2346_p0 = scmp.lt.s32.totalorder %s635_s22, %s2344_s29 }
 0x182   : > { %p2341_p10 = pnand %p2339_p3, %p3690_p12  ;;  %p2347_p8 = scmp.lt.s32.totalorder %s2345_s0, %s2338_s15 }
 0x184   : > { %p2342_p5 = pneg %p2341_p10  ;;  %p2348_p7 = por %p2347_p8, %p2346_p0 }
 0x186   : > { %p2349_p4 = pnand %p2348_p7, %p2342_p5 }
 0x188   : > { %2352 = shalt.err (!%p2349_p4)
}
 0x189   : > { %p3695_p11 = scmp.ne.s32.totalorder %s3669_s25, 0  ;;  %s3696_s3 = scalar_lea.sflag [#allocation17], %s2957_s23 }
 0x18a   : > { %s665_s17 = scalar_lea.vmem [#allocation21], %s3005_s28  ;;  %s1703_s11 = sshll.u32 %s3005_s28, 2 }
 0x18b   : > { %1874 = dma.hbm_to_vmem [thread:$0]  (!%p3695_p11), %s3223_s8, 16, %s635_s22, %s3696_s3  }
 0x18c   : > { %s672_s16 = sshll.u32 %s665_s17, 4  ;;  %s2353_s30 = scalar_lea.hbm %s3230_s14, 16  ;;  %s673_s16 = int_to_ptr.vmem [resolvable:$true] %s672_s16 }
 0x18d   : > { %p2354_p7 = scmp.ne.s32.totalorder %s3230_s14, %s2353_s30  ;;  %s2358_s9 = scalar_lea.hbm %s3694_s5, 64 }
 0x18e   : > { %p2359_p1 = scmp.lt.u32.totalorder %s3230_s14, %s3694_s5  ;;  %p2360_p2 = scmp.lt.u32.totalorder %s2358_s9, %s2353_s30 }
 0x18f   : > { %p2356_p9 = pnand %p2354_p7, %p3690_p12  ;;  %p2362_p3 = scmp.lt.u32.totalorder %s2353_s30, %s3230_s14 }
 0x190   : > { %p2361_p6 = por %p2360_p2, %p2359_p1 }
 0x191   : > { %p2357_p13 = pneg %p2356_p9 }
 0x192   : > { %p2363_p10 = por %p2362_p3, %p2361_p6 }
 0x194   : > { %p2364_p5 = pnand %p2363_p10, %p2357_p13 }
 0x196   : > { %2367 = shalt.err (!%p2364_p5)
}
 0x197   : > { %s2368_s8 = scalar_lea.vmem %s673_s16, 16  ;;  %s2634_s22 = smov [#allocation21]  }
 0x198   : > { %p2369_p0 = scmp.ne.s32.totalorder %s673_s16, %s2368_s8  ;;  %s2373_s29 = sshll.u32 %s2634_s22, 4  ;;  %s2374_s29 = int_to_ptr.vmem [resolvable:$false] %s2373_s29 }
 0x199   : > { %s2375_s0 = scalar_lea.vmem %s2374_s29, 32  ;;  %p2376_p7 = scmp.lt.s32.totalorder %s673_s16, %s2374_s29 }
 0x19a   : > { %p2371_p8 = pnand %p2369_p0, %p3690_p12  ;;  %p2377_p9 = scmp.lt.s32.totalorder %s2375_s0, %s2368_s8 }
 0x19c   : > { %p2372_p4 = pneg %p2371_p8  ;;  %p2378_p11 = por %p2377_p9, %p2376_p7 }
 0x19e   : > { %p2379_p1 = pnand %p2378_p11, %p2372_p4 }
 0x1a0   : > { %2382 = shalt.err (!%p2379_p1)
}
 0x1a1   : > { %p3697_p2 = scmp.ne.s32.totalorder %s3669_s25, 0  ;;  %s1704_s3 = sshll.u32 %s2611_s24, 6 }
 0x1a2   : > { %s3698_s26 = sld [smem:[#allocation70_spill]]  ;;  %s683_s15 = scalar_lea.vmem [#allocation22], %s1703_s11 }
 0x1a3   : > { %1880 = dma.hbm_to_vmem [thread:$0]  (!%p3697_p2), %s3230_s14, 16, %s673_s16, %s642_s6  }
 0x1a4   : > { %s690_s19 = sshll.u32 %s683_s15, 4  ;;  %s680_s8 = scalar_lea.sflag [#allocation23], %s2957_s23  ;;  %s691_s19 = int_to_ptr.vmem [resolvable:$true] %s690_s19 }
 0x1a8   : > { %s3699_s7 = smov %s3698_s26  ;;  %s3276_s9 = scalar_lea.hbm %s3698_s26, %s1704_s3 }
 0x1a9   : > { %s2383_s22 = scalar_lea.hbm %s3276_s9, 64  ;;  %s2388_s16 = scalar_lea.hbm %s3699_s7, 256 }
 0x1aa   : > { %p2384_p11 = scmp.ne.s32.totalorder %s3276_s9, %s2383_s22  ;;  %p2389_p3 = scmp.lt.u32.totalorder %s3276_s9, %s3699_s7 }
 0x1ab   : > { %p2390_p10 = scmp.lt.u32.totalorder %s2388_s16, %s2383_s22  ;;  %p2392_p0 = scmp.lt.u32.totalorder %s2383_s22, %s3276_s9 }
 0x1ac   : > { %p2386_p13 = pnand %p2384_p11, %p3690_p12 }
 0x1ad   : > { %p2391_p5 = por %p2390_p10, %p2389_p3 }
 0x1ae   : > { %p2387_p6 = pneg %p2386_p13 }
 0x1af   : > { %p2393_p8 = por %p2392_p0, %p2391_p5 }
 0x1b1   : > { %p2394_p4 = pnand %p2393_p8, %p2387_p6 }
 0x1b3   : > { %2397 = shalt.err (!%p2394_p4)
}
 0x1b4   : > { %s2398_s23 = scalar_lea.vmem %s691_s19, 64  ;;  %s2635_s28 = smov [#allocation22]  }
 0x1b5   : > { %p2399_p7 = scmp.ne.s32.totalorder %s691_s19, %s2398_s23  ;;  %s2403_s11 = sshll.u32 %s2635_s28, 4  ;;  %s2404_s11 = int_to_ptr.vmem [resolvable:$false] %s2403_s11 }
 0x1b6   : > { %s2405_s3 = scalar_lea.vmem %s2404_s11, 128  ;;  %p2406_p11 = scmp.lt.s32.totalorder %s691_s19, %s2404_s11 }
 0x1b7   : > { %p2401_p9 = pnand %p2399_p7, %p3690_p12  ;;  %p2407_p13 = scmp.lt.s32.totalorder %s2405_s3, %s2398_s23 }
 0x1b9   : > { %p2402_p1 = pneg %p2401_p9  ;;  %p2408_p2 = por %p2407_p13, %p2406_p11 }
 0x1bb   : > { %p2409_p3 = pnand %p2408_p2, %p2402_p1 }
 0x1bd   : > { %2412 = shalt.err (!%p2409_p3)
}
 0x1be   : > { %p3700_p10 = scmp.ne.s32.totalorder %s3669_s25, 0  ;;  %s3701_s17 = sld [smem:[#allocation49_spill]] }
 0x1c0   : > { %1883 = dma.hbm_to_vmem [thread:$0]  (!%p3700_p10), %s3276_s9, 64, %s691_s19, %s680_s8  }
 0x1c4   : > { %p3702_p6 = scmp.ne.s32.totalorder %s3701_s17, 0 }
 0x1c5   : > { %s3301_s18 = sand.u32 (!%p3702_p6), 1, %s2595_s20   ;;  %p3703_p12 = scmp.ne.s32.totalorder (!%p3702_p6), %s3653_s10, 0 }
 0x1c6   : > { %699 = sbr.rel (%p3702_p6) target bundleno = 1760 (0x6e0), region = 72  ;;  %s3304_s30 = sshll.u32 (!%p3702_p6), %s3301_s18, 3 }
 0x1c7   : > { %s702_s26 = scalar_lea.sflag (!%p3702_p6), [#allocation5], %s3301_s18  ;;  %s705_s15 = scalar_lea.vmem (!%p3702_p6), [#allocation4], %s3304_s30 }
 0x1cd   : > { %2526 = dma.done.wait (%p3703_p12), %s702_s26, 128  }
 0x1ce   : > { %2528 = vsyncadd (%p3703_p12), %s702_s26, 4294967168  ;;  %s3313_s25 = sand.u32 1, %s2785_s27   ;;  %s714_s19 = scalar_lea.vmem [#allocation7], %s3304_s30 }
 0x1cf   : > { %s711_s9 = scalar_lea.sflag [#allocation8], %s3313_s25 }
 0x1d0   : > { %2530 = dma.done.wait (%p3703_p12), %s711_s9, 256  }
 0x1d1   : > { %2532 = vsyncadd (%p3703_p12), %s711_s9, 4294967040  ;;  %s723_s8 = scalar_lea.vmem [#allocation9], %s3304_s30  ;;  %p3704_p2 = scmp.eq.s32.totalorder %s2785_s27, 0 }
 0x1d3   : > { %2534 = dma.done.wait (%p3704_p2), [#allocation11], 256   ;;  %p3705_p5 = pmov %p3704_p2 }
 0x1d4   : > { %s3706_s22 = sld [smem:[#allocation41_spill]]  ;;  %s3707_s6 = sld [smem:[#allocation48_spill]] }
 0x1d5   : > { %2536 = vsyncadd (%p3705_p5), [#allocation11], 4294967040  ;;  %s737_s29 = scalar_lea.sflag [#allocation14], %s3313_s25 }
 0x1da   : > { %s3327_s14 = sand.u32 1, %s3706_s22   ;;  %p3708_p0 = scmp.ne.s32.totalorder %s3707_s6, 0 }
 0x1db   : > { %s3330_s16 = sshll.u32 %s3327_s14, 4 }
 0x1dc   : > { %s740_s10 = scalar_lea.vmem [#allocation13], %s3330_s16 }
 0x1dd   : > { %2538 = dma.done.wait (%p3708_p0), %s737_s29, 272  }
 0x1de   : > { %2540 = vsyncadd (%p3708_p0), %s737_s29, 4294967024  ;;  %s748_s0 = scalar_lea.vmem [#allocation15], %s3327_s14  ;;  %s754_s23 = scalar_lea.sflag [#allocation17], %s3313_s25 }
 0x1df   : > { %s757_s28 = scalar_lea.vmem [#allocation16], %s3330_s16 }
 0x1e0   : > { %2542 = dma.done.wait (%p3708_p0), %s754_s23, 272  }
 0x1e1   : > { %2544 = vsyncadd (%p3708_p0), %s754_s23, 4294967024  ;;  %s765_s11 = scalar_lea.vmem [#allocation18], %s3327_s14  ;;  %s771_s3 = scalar_lea.sflag [#allocation20], %s3313_s25 }
 0x1e2   : > { %s774_s17 = scalar_lea.vmem [#allocation19], %s3330_s16 }
 0x1e3   : > { %2546 = dma.done.wait (%p3708_p0), %s771_s3, 272  }
 0x1e4   : > { %2548 = vsyncadd (%p3708_p0), %s771_s3, 4294967024  ;;  %s1714_s26 = sshll.u32 %s3327_s14, 2  ;;  %s782_s9 = scalar_lea.vmem [#allocation21], %s3327_s14 }
 0x1e5   : > { %s788_s22 = scalar_lea.sflag [#allocation23], %s3313_s25  ;;  %s3355_s29 = scalar_lea.vmem [#allocation22], %s1714_s26 }
 0x1e6   : > { %2550 = dma.done.wait (%p3708_p0), %s788_s22, 64  }
 0x1e7   : > { %2552 = vsyncadd (%p3708_p0), %s788_s22, 4294967232  ;;  %p3709_p8 = pmov %p3704_p2 }
 0x1e8   : > { %p3710_p4 = pmov %p3704_p2 }
 0x1e9   : > { %2554 = dma.done.wait (%p3709_p8), [#allocation23], 16  }
 0x1ea   : > { %2556 = vsyncadd (%p3710_p4), [#allocation23], 4294967280  ;;  %v2636_v0 = vmov 0.0   ;;  %vm2637_vm0 = vmmov 0   ;;  %v2019_v1 = vld [vmem:[%s757_s28] sm:$0xff]   ;;  %v2020_v2 = vld [vmem:[%s757_s28 + $0x8] sm:$0xff]  }
 0x1eb   : > { %1765 = vmatprep.subr.bf16.mxu0 %v2636_v0  ;;  %1769 = vmatprep.mubr.msk.bf16.mxu0 %vm2637_vm0, %v2636_v0  ;;  %v892_v3 = vld [vmem:[%s714_s19] sm:$0xff]  ;;  %v2021_v6 = vld [vmem:[%s740_s10] sm:$0xff]   ;;  %vm922_vm1 = vcmask 261120   ;;  %s3711_s27 = sld [smem:[#allocation44_spill]]  ;;  %vm1035_vm2 = vcmask 60416   ;;  %vm1117_vm3 = vcmask 64512  }
 0x1ec   : > { %1773 = vmatprep.subr.bf16.mxu1 %v2636_v0  ;;  %1777 = vmatprep.mubr.msk.bf16.mxu1 %vm2637_vm0, %v2636_v0  ;;  %v893_v4 = vld [vmem:[#allocation12] sm:$0xff]  ;;  %v1041_v8 = vld [vmem:[%s705_s15] sm:$0xff]  ;;  %v1042_v9 = vld [vmem:[#allocation10] sm:$0xff]  ;;  %vm1183_vm4 = vcmask 1043456  }
 0x1ed   : > { %1766 = vmatpush3.bf16.msra.mxu0 %v2019_v1  ;;  %v894_v5 = vadd.f32 %v893_v4, %v892_v3  ;;  %v1043_v10 = vadd.f32 %v1042_v9, %v1041_v8  ;;  %v2022_v11 = vld [vmem:[%s740_s10 + $0x8] sm:$0xff]   ;;  %v896_v15 = vld [vmem:[%s723_s8] sm:$0xff]  ;;  %s3712_s8 = sld [smem:[#allocation39_spill]]  ;;  %s3425_s10 = scalar_lea.vmem [#allocation25], %s3304_s30 }
 0x1ee   : > { %1767 = vmatprep.subr.bf16.mxu0 %v2636_v0  ;;  %v2023_v13 = vld [vmem:[%s774_s17] sm:$0xff]   ;;  %v2024_v14 = vld [vmem:[%s774_s17 + $0x8] sm:$0xff]   ;;  %v897_v16 = vadd.f32 %v896_v15, %v893_v4 }
 0x1ef   : > { %v895_v7 = vpack.c.bf16 %v894_v5, %v894_v5  ;;  %v1044_v12 = vpack.c.bf16 %v1043_v10, %v1043_v10  ;;  %1774 = vmatpush3.bf16.msra.mxu1 %v2023_v13  ;;  %v1718_v18 = vld [vmem:[%s765_s11] ss:$0 sm:$0xff] }
 0x1f0   : > { %1775 = vmatprep.subr.bf16.mxu1 %v2636_v0  ;;  %v898_v17 = vpack.c.bf16 %v897_v16, %v897_v16  ;;  %v1728_v25 = vld [vmem:[%s748_s0] ss:$0 sm:$0xff] }
 0x1f1   : > { %1768 = vmatpush3.bf16.msra.mxu0 %v2020_v2  ;;  %s1726_s15 = sshll.u32 %s3711_s27, 2  ;;  %v1722_v35 = vld [vmem:[%s782_s9] ss:$0 sm:$0xff]  ;;  %p1736_p7 = scmp.ne.s32.totalorder %s3711_s27, 0 }
 0x1f2   : > { %1781 = vmatprep.subr.bf16.mxu0 %v2636_v0  ;;  %s1034_s25 = scalar_lea.vmem [#allocation2], %s1726_s15  ;;  %s1039_s19 = scalar_lea.vmem [#allocation3], %s1726_s15  ;;  %v2638_v62 = vmov (!%p1736_p7), 0.0  }
 0x1f3   : > { %1776 = vmatpush3.bf16.msra.mxu1 %v2024_v14  ;;  %s884_s6 = sand.u32 1, %s3712_s8   ;;  %1231 = vst.msk [vmem:[%s3425_s10] sm:$0xff] (!%p1736_p7), %vm922_vm1, %v2638_v62 }
 0x1f4   : > { %1770 = vmatmul.mubr.msk.bf16.vlgmr.msra.gmra.mrb[0].mxu0 %vm922_vm1, %v895_v7  ;;  %1789 = vmatprep.subr.bf16.mxu1 %v2636_v0  ;;  %s3417_s14 = sshll.u32 %s884_s6, 3 }
 0x1f5   : > { %1782 = vmatpush3.bf16.msra.mxu0 %v2021_v6  ;;  %1785 = vmatprep.mubr.msk.bf16.mxu0 %vm2637_vm0, %v2636_v0  ;;  %s886_s16 = scalar_lea.vmem [#allocation26], %s3417_s14 }
 0x1f6   : > { %1783 = vmatprep.subr.bf16.mxu0 %v2636_v0  ;;  %1778 = vmatmul.mubr.msk.bf16.vlgmr.msra.gmra.mrb[0].mxu1 %vm922_vm1, %v898_v17 }
 0x1f7   : > { %1791 = vmatprep.mubr.msk.bf16.mxu1 %vm2637_vm0, %v2636_v0 }
 0x1f9   : > { %1784 = vmatpush3.bf16.msra.mxu0 %v2022_v11 }
 0x1fa   : > { %1795 = vmatprep.subr.bf16.mxu0 %v2636_v0 }
 0x1fc   : > { %1786 = vmatmul.mubr.msk.bf16.vlgmr.msra.gmra.mrb[4].mxu0 %vm922_vm1, %v1044_v12 }
 0x1fd   : > { %1797 = vmatprep.mubr.msk.bf16.mxu0 %vm2637_vm0, %v2636_v0 }
 0x2c7   : > { %v960_v19 = vpop.f32.mrb[0].mxu0 }
 0x2c8   : > { %v961_v20 = vadd.f32 %v1718_v18, %v960_v19  ;;  %v1771_v21 = vpop.f32.mrb[1].mxu0 }
 0x2c9   : > { %v963_v22 = vpop.f32.mrb[2].mxu0  ;;  %v1026_v36 = vpop.f32.mrb[0].mxu1 }
 0x2ca   : > { %v1032_v23 = vpack.c.bf16 %v961_v20, %v961_v20  ;;  %v1772_v24 = vpop.f32.mrb[3].mxu0  ;;  %v1779_v37 = vpop.f32.mrb[1].mxu1  ;;  %v1027_v38 = vadd.f32 %v1722_v35, %v1026_v36 }
 0x2cb   : > { %v1029_v39 = vpop.f32.mrb[2].mxu1 }
 0x2cc   : > { %1036 = vst.msk [vmem:[%s1034_s25] sm:$0xf] %vm1035_vm2, %v1032_v23  ;;  %v1780_v40 = vpop.f32.mrb[3].mxu1  ;;  %v1037_v41 = vpack.c.bf16 %v1027_v38, %v1027_v38 }
 0x2ce   : > { %1040 = vst.msk [vmem:[%s1039_s19] sm:$0xf] %vm1035_vm2, %v1037_v41 }
 0x2cf   : > { %v1106_v26 = vpop.f32.mrb[4].mxu0 }
 0x2d0   : > { %v1107_v27 = vadd.f32 %v1728_v25, %v1106_v26  ;;  %v1787_v28 = vpop.f32.mrb[5].mxu0 }
 0x2d1   : > { %v1109_v29 = vpop.f32.mrb[6].mxu0 }
 0x2d2   : > { %v1788_v30 = vpop.f32.mrb[7].mxu0  ;;  %v1112_v32 = vmul.f32 0.35355338, %v1107_v27 }
 0x2d3   : > { %v1116_v31 = vld [vmem:[%s1034_s25] sm:$0xf] }
 0x2d4   : > { %v1122_v33 = vsel %vm1117_vm3, %v1116_v31, 0  ;;  %v1113_v34 = vpack.c.bf16 %v1112_v32, %v1112_v32 }
 0x2d5   : > { %1790 = vmatpush3.bf16.xpose.msra.mxu1 %v1122_v33  ;;  %v1179_v42 = vld [vmem:[%s1039_s19] sm:$0xf] }
 0x2d6   : > { %v1185_v43 = vsel %vm1183_vm4, %v1179_v42, 0 }
 0x2d7   : > { %1796 = vmatpush3.bf16.msra.mxu0 %v1185_v43 }
 0x2dc   : > { %1792 = vmatmul.mubr.msk.bf16.vlgmr.msra.gmra.mrb[4].mxu1 %vm1117_vm3, %v1113_v34 }
 0x3af   : > { %v1158_v44 = vpop.f32.mrb[4].mxu1 }
 0x3b0   : > { %v1793_v45 = vpop.f32.mrb[5].mxu1  ;;  %v1164_v46 = vsel %vm1117_vm3, %v1158_v44, -inf }
 0x3b1   : > { %1165 = vmax.xlane.f32.xlu0 %v1164_v46  ;;  %v1161_v47 = vpop.f32.mrb[6].mxu1 }
 0x3b2   : > { %v1794_v48 = vpop.f32.mrb[7].mxu1 }
 0x43e   : > { %v1166_v49 = vpop.xlane.xlu0 %1165 }
 0x43f   : > { %v1167_v50 = vsub.f32 %v1158_v44, %v1166_v49 }
 0x441   : > { %v1168_v51 = vmul.f32 1.442695, %v1167_v50 }
 0x443   : > { %2025 = vpow2.f32 %v1168_v51 }
 0x44d   : > { %v2026_v52 = vpop.eup %2025 }
 0x44e   : > { %v1170_v53 = vsel %vm1117_vm3, %v2026_v52, 0.0 }
 0x44f   : > { %1171 = vadd.xlane.f32.xlu0 %v1170_v53 }
 0x4dc   : > { %v1172_v54 = vpop.xlane.xlu0 %1171 }
 0x4dd   : > { %2027 = vrcp.f32 %v1172_v54 }
 0x4e7   : > { %v2028_v55 = vpop.eup %2027 }
 0x4e8   : > { %v1174_v56 = vmul.f32 %v2028_v55, %v2026_v52 }
 0x4ea   : > { %1175 = vst.msk [vmem:[%s886_s16] sm:$0xff] %vm1117_vm3, %v1174_v56  ;;  %v1176_v57 = vpack.c.bf16 %v1174_v56, %v1174_v56 }
 0x4ec   : > { %1798 = vmatmul.mubr.msk.bf16.vlgmr.msra.gmra.mrb[8].mxu0 %vm1117_vm3, %v1176_v57 }
 0x5bc   : > { %1230 = sbr.rel (%p1736_p7) target bundleno = 1475 (0x5c3), region = 132 }
 0x5bf   : > { %v1221_v58 = vpop.f32.mrb[8].mxu0 }
 0x5c0   : > { %v1799_v59 = vpop.f32.mrb[9].mxu0 }
 0x5c1   : > { %v1224_v60 = vpop.f32.mrb[10].mxu0 }
 0x5c2   : > { %v1800_v61 = vpop.f32.mrb[11].mxu0 }
 0x5c3 PF: > { %1801 = vmatprep.subr.bf16.mxu1 %v2636_v0  ;;  %v1234_v63 = vld [vmem:[%s3355_s29] sm:$0xf]  ;;  %1803 = vmatprep.mubr.msk.bf16.mxu1 %vm2637_vm0, %v2636_v0  ;;  %v1233_v2 = vpack.c.bf16 %v1221_v58, %v1221_v58  ;;  %v1232_v3 = vld [vmem:[%s3425_s10] sm:$0xff]  ;;  %s3713_s30 = sld [smem:[#allocation44_spill]] }
 0x5c4   : > { %v1239_v1 = vsel %vm1183_vm4, %v1234_v63, 0 }
 0x5c5   : > { %1802 = vmatpush3.bf16.msra.mxu1 %v1239_v1 }
 0x5c8   : > { %1804 = vmatmul.mubr.msk.bf16.vlgmr.msra.gmra.mrb[8].mxu1 %vm1117_vm3, %v1233_v2 }
 0x5c9   : > { %p1738_p9 = scmp.ne.s32.totalorder %s3713_s30, 3 }
 0x5ca   : > { %v1739_v9 = vld [vmem:[#allocation24] ss:$0 sm:$0xff] (!%p1738_p9) }
 0x698   : > { %1286 = sbr.rel (%p1738_p9) target bundleno = 1705 (0x6a9), region = 136 }
 0x69b   : > { %v1275_v4 = vpop.f32.mrb[8].mxu1 }
 0x69c   : > { %v1281_v5 = vadd.f32 %v1275_v4, %v1232_v3  ;;  %v1805_v6 = vpop.f32.mrb[9].mxu1 }
 0x69d   : > { %v1278_v7 = vpop.f32.mrb[10].mxu1 }
 0x69e   : > { %1282 = vst.msk [vmem:[%s3425_s10] sm:$0xff] %vm922_vm1, %v1281_v5  ;;  %v1806_v8 = vpop.f32.mrb[11].mxu1 }
 0x6a5   : > { %v1287_v0 = vld [vmem:[%s3425_s10] sm:$0xff] }
 0x6a6   : > { %v1295_v10 = vadd.f32 %v1739_v9, %v1287_v0 }
 0x6a8   : > { %1296 = vst.msk [vmem:[%s3425_s10] sm:$0xff] %vm922_vm1, %v1295_v10 }
 0x6a9 PF: > { %s3714_s0 = sld [smem:[#allocation45_spill]]  ;;  %s3715_s23 = sld [smem:[#allocation54_spill]] }
 0x6aa   : > { %s3716_s17 = sld [smem:[#allocation72_spill]]  ;;  %s1317_s22 = sshll.u32 %s3425_s10, 4  ;;  %s1318_s22 = int_to_ptr.vmem [resolvable:$true] %s1317_s22 }
 0x6ab   : > { %s1298_s29 = scalar_lea.sflag [#allocation6], %s3301_s18  ;;  %s2413_s27 = scalar_lea.vmem %s1318_s22, 128 }
 0x6ac   : > { %p2414_p1 = scmp.ne.s32.totalorder %s1318_s22, %s2413_s27  ;;  %s2639_s15 = smov [#allocation25]  }
 0x6ad   : > { %s2417_s25 = sshll.u32 %s2639_s15, 4  ;;  %s2418_s25 = int_to_ptr.vmem [resolvable:$false] %s2417_s25 }
 0x6ae   : > { %s2419_s19 = scalar_lea.vmem %s2418_s25, 256  ;;  %p2420_p10 = scmp.lt.s32.totalorder %s1318_s22, %s2418_s25 }
 0x6af   : > { %s1742_s28 = sshll.u32 %s3714_s0, 7  ;;  %p3718_p11 = scmp.ne.s32.totalorder %s3715_s23, 0 }
 0x6b0   : > { %s3717_s9 = smov %s3716_s17  ;;  %s3447_s26 = scalar_lea.hbm %s3716_s17, %s1742_s28 }
 0x6b1   : > { %p2415_p13 = pnand %p2414_p1, %p3718_p11  ;;  %p2421_p6 = scmp.lt.s32.totalorder %s2419_s19, %s2413_s27 }
 0x6b3   : > { %p2416_p3 = pneg %p2415_p13  ;;  %p2422_p12 = por %p2421_p6, %p2420_p10 }
 0x6b5   : > { %p2423_p2 = pnand %p2422_p12, %p2416_p3 }
 0x6b7   : > { %2426 = shalt.err (!%p2423_p2)
}
 0x6b8   : > { %s2427_s18 = scalar_lea.hbm %s3447_s26, 128  ;;  %s2431_s30 = scalar_lea.hbm %s3717_s9, 256 }
 0x6b9   : > { %p2428_p5 = scmp.ne.s32.totalorder %s3447_s26, %s2427_s18  ;;  %p2432_p4 = scmp.lt.u32.totalorder %s3447_s26, %s3717_s9 }
 0x6ba   : > { %p2433_p7 = scmp.lt.u32.totalorder %s2431_s30, %s2427_s18  ;;  %p2435_p1 = scmp.lt.u32.totalorder %s2427_s18, %s3447_s26 }
 0x6bb   : > { %p2429_p0 = pnand %p2428_p5, %p3718_p11 }
 0x6bc   : > { %p2434_p9 = por %p2433_p7, %p2432_p4 }
 0x6bd   : > { %p2430_p8 = pneg %p2429_p0 }
 0x6be   : > { %p2436_p13 = por %p2435_p1, %p2434_p9 }
 0x6c0   : > { %p2437_p3 = pnand %p2436_p13, %p2430_p8 }
 0x6c2   : > { %2440 = shalt.err (!%p2437_p3)
}
 0x6c3   : > { %s3719_s3 = sld [smem:[#allocation44_spill]]  ;;  %s3721_s27 = sld [smem:[#allocation57_spill]] }
 0x6c4   : > { %1839 = dma.vmem_to_hbm [thread:$0]  (%p3718_p11), %s1318_s22, 128, %s3447_s26, %s1298_s29  }
 0x6c5   : > { %s1743_s15 = sshll.u32 %s3714_s0, 2  ;;  %s1333_s25 = sshll.u32 %s886_s16, 4  ;;  %s3472_s25 = int_to_ptr.vmem [resolvable:$true] %s1333_s25 }
 0x6c6   : > { %s3722_s23 = sld [smem:[#allocation73_spill]]  ;;  %s1303_s11 = scalar_lea.sflag [#allocation27], %s884_s6 }
 0x6c7   : > { %s2441_s1 = scalar_lea.vmem %s3472_s25, 128  ;;  %s2640_s14 = smov [#allocation26]  }
 0x6c8   : > { %p2442_p10 = scmp.ne.s32.totalorder %s3472_s25, %s2441_s1  ;;  %s2445_s16 = sshll.u32 %s2640_s14, 4  ;;  %s2446_s16 = int_to_ptr.vmem [resolvable:$false] %s2445_s16 }
 0x6c9   : > { %s1329_s19 = sadd.s32 %s3719_s3, %s1743_s15  ;;  %p3724_p6 = scmp.ne.s32.totalorder %s3721_s27, 0 }
 0x6ca   : > { %s1744_s18 = sshll.u32 %s1329_s19, 7  ;;  %s2447_s0 = scalar_lea.vmem %s2446_s16, 256 }
 0x6cb   : > { %p2443_p11 = pnand %p2442_p10, %p3724_p6  ;;  %p2448_p2 = scmp.lt.s32.totalorder %s3472_s25, %s2446_s16 }
 0x6cc   : > { %s3723_s28 = smov %s3722_s23  ;;  %s1331_s30 = scalar_lea.hbm %s3722_s23, %s1744_s18 }
 0x6cd   : > { %p2444_p12 = pneg %p2443_p11  ;;  %p2449_p5 = scmp.lt.s32.totalorder %s2447_s0, %s2441_s1 }
 0x6cf   : > { %p2450_p0 = por %p2449_p5, %p2448_p2 }
 0x6d1   : > { %p2451_p8 = pnand %p2450_p0, %p2444_p12 }
 0x6d3   : > { %2454 = shalt.err (!%p2451_p8)
}
 0x6d4   : > { %s2455_s26 = scalar_lea.hbm %s1331_s30, 128  ;;  %s2459_s29 = scalar_lea.hbm %s3723_s28, 1024 }
 0x6d5   : > { %p2456_p4 = scmp.ne.s32.totalorder %s1331_s30, %s2455_s26  ;;  %p2460_p1 = scmp.lt.u32.totalorder %s1331_s30, %s3723_s28 }
 0x6d6   : > { %p2461_p13 = scmp.lt.u32.totalorder %s2459_s29, %s2455_s26  ;;  %p2463_p10 = scmp.lt.u32.totalorder %s2455_s26, %s1331_s30 }
 0x6d7   : > { %p2457_p7 = pnand %p2456_p4, %p3724_p6 }
 0x6d8   : > { %p2462_p3 = por %p2461_p13, %p2460_p1 }
 0x6d9   : > { %p2458_p9 = pneg %p2457_p7 }
 0x6da   : > { %p2464_p11 = por %p2463_p10, %p2462_p3 }
 0x6dc   : > { %p2465_p12 = pnand %p2464_p11, %p2458_p9 }
 0x6de   : > { %2468 = shalt.err (!%p2465_p12)
}
 0x6df   : > { %1840 = dma.vmem_to_hbm [thread:$0]  (%p3724_p6), %s3472_s25, 128, %s1331_s30, %s1303_s11  }
 0x6e0 PF: > { %s3725_s1 = sld [smem:[#allocation47_spill]]  ;;  %s3726_s15 = sld [smem:[#allocation43_spill]] }
 0x6e1   : > { %s3727_s19 = sld [smem:[#allocation55_spill]] }
 0x6e6   : > { %p1898_p2 = scmp.ge.s32.totalorder %s3725_s1, 2  ;;  %s1345_s18 = sand.u32 1, %s3726_s15  }
 0x6e7   : > { %p3728_p5 = scmp.ne.s32.totalorder %s3727_s19, 0  ;;  %s1346_s8 = scalar_lea.sflag [#allocation6], %s1345_s18 }
 0x6e9   : > { %p1885_p0 = pnand %p1898_p2, %p3728_p5 }
 0x6eb   : > { %2558 = dma.done.wait (!%p1885_p0), %s1346_s8, 128  }
 0x6ec   : > { %2560 = vsyncadd (!%p1885_p0), %s1346_s8, 4294967168  ;;  %s3729_s10 = sld [smem:[#allocation38_spill]]  ;;  %s3730_s23 = sld [smem:[#allocation58_spill]] }
 0x6f2   : > { %s1354_s14 = sand.u32 1, %s3729_s10   ;;  %p3731_p8 = scmp.ne.s32.totalorder %s3730_s23, 0 }
 0x6f3   : > { %s1355_s16 = scalar_lea.sflag [#allocation27], %s1354_s14 }
 0x6f4   : > { %p1888_p4 = pnand %p1898_p2, %p3731_p8 }
 0x6f6   : > { %2562 = dma.done.wait (!%p1888_p4), %s1355_s16, 128  }
 0x6f7   : > { %2564 = vsyncadd (!%p1888_p4), %s1355_s16, 4294967168  ;;  %s50_s26 = sadd.s32 1, %s3725_s1   ;;  %s3733_s29 = sld [smem:[#allocation39_spill]] }
 0x6f8   : > { %p3503_p6 = scmp.ge.s32.totalorder %s50_s26, 10   ;;  %s3734_s30 = sld [smem:[#allocation40_spill]] }
 0x6f9   : > { %s3735_s15 = sld [smem:[#allocation56_spill]]  ;;  %s3736_s16 = sld [smem:[#allocation41_spill]] }
 0x6fa   : > { %s3737_s17 = sld [smem:[#allocation42_spill]]  ;;  %s3738_s18 = sld [smem:[#allocation52_spill]] }
 0x6fb   : > { %s3739_s25 = sld [smem:[#allocation53_spill]]  ;;  %s3740_s23 = sld [smem:[#allocation46_spill]] }
 0x6fc   : > { %s3741_s11 = sld [smem:[#allocation50_spill]]  ;;  %s3742_s0 = sld [smem:[#allocation51_spill]] }
 0x6fd   : > { %s3743_s19 = smov %s2595_s20  ;;  %s3744_s20 = smov %s2599_s21 }
 0x6fe   : > { %s3746_s22 = smov %s2611_s24  ;;  %49 = sbr.rel (!%p3503_p6) target bundleno = 39 (0x27), region = 272 }
 0x701   : > { %s3745_s21 = smov %s3739_s25 }
 0x702   : > { %s3747_s24 = smov %s3741_s11  ;;  %s3748_s25 = smov %s3742_s0 }
 0x705   :  { %1360 = vsyncpa [#allocation5], 1 }
 0x706   :  { %1362 = vsyncpa [#allocation5 + $0x1], 1 }
 0x707   :  { %1363 = vsyncpa [#allocation8], 1 }
 0x708   :  { %1365 = vsyncpa [#allocation8 + $0x1], 1 }
 0x709   :  { %1366 = vsyncpa [#allocation11], 1 }
 0x70a   :  { %1367 = vsyncpa [#allocation14], 1 }
 0x70b   :  { %1369 = vsyncpa [#allocation14 + $0x1], 1 }
 0x70c   :  { %1370 = vsyncpa [#allocation17], 1 }
 0x70d   :  { %1372 = vsyncpa [#allocation17 + $0x1], 1 }
 0x70e   :  { %1373 = vsyncpa [#allocation20], 1 }
 0x70f   :  { %1375 = vsyncpa [#allocation20 + $0x1], 1 }
 0x710   :  { %1376 = vsyncpa [#allocation23], 1 }
 0x711   :  { %1378 = vsyncpa [#allocation23 + $0x1], 1 }
 0x712   :  { %1379 = vsyncpa [#allocation6], 1 }
 0x713   :  { %1381 = vsyncpa [#allocation6 + $0x1], 1 }
 0x714   :  { %1382 = vsyncpa [#allocation27], 1 }
 0x715   :  { %1384 = vsyncpa [#allocation27 + $0x1], 1 }

</bundles_post_ra>
